<compile_context>
chip_gen: v7x
topology: tpu7x:2x2x1
jax: 0.10.0
libtpu: 0.0.40
codegen_flags: <defaults>
</compile_context>

<pallas_src>
import functools

import jax
import jax.numpy as jnp
from jax.experimental import pallas as pl
from jax.experimental.pallas import tpu as pltpu

IN_FEATURES = 256 * 18   # 4608
HIDDEN = 128
OUT = 1

SELU_ALPHA = 1.6732632423543772
SELU_SCALE = 1.0507009873554805


def _round_up(x, m):
    return (x + m - 1) // m * m


def _choose_tile(b_pad, block_batch):
    """Largest multiple-of-16 divisor of b_pad that is <= block_batch, capped at
    b_pad // 2 when possible so the 'parallel' batch axis always has >= 2 tiles
    (megacore sharding on v7x).  b_pad is always a multiple of 16."""
    cap = min(max(block_batch, 16), b_pad)
    if b_pad >= 32:
        cap = min(cap, b_pad // 2)
    tm = 16
    for cand in range(16, cap + 1, 16):
        if b_pad % cand == 0:
            tm = cand
    return tm


def _disc_kernel(x_ref, w1_ref, b1_ref, w2r_ref, b2_ref, o_ref):
    """One batch tile: (tm, 4608) @ (4608, 128) -> SELU -> (.,128)·w2 -> sigmoid."""
    # In-vreg downcast to bf16 (hidden under the x tile DMA); f32 accumulation
    # on the MXU.  If the caller already stores x / W1 in bf16 these are no-ops.
    x = x_ref[...].astype(jnp.bfloat16)
    w1 = w1_ref[...].astype(jnp.bfloat16)
    h = jnp.dot(x, w1, preferred_element_type=jnp.float32)     # (tm, 128) f32
    h = h + b1_ref[...].astype(jnp.float32)                    # (1, 128) broadcasts

    # SELU.  Forward-only: the unselected exp branch can only reach +inf and is
    # discarded by the where; switch to expm1 if a VJP is ever added.
    h = SELU_SCALE * jnp.where(h > 0, h, SELU_ALPHA * (jnp.exp(h) - 1.0))

    # Second Linear (128 -> 1) on the VPU: broadcast-mul + lane reduction (a
    # (128, 1) MXU tile would waste 255/256 columns).  Exact sigmoid — free,
    # the kernel is HBM-bound everywhere.
    y = jnp.sum(h * w2r_ref[...].astype(jnp.float32), axis=-1, keepdims=True)
    y = y + b2_ref[...].astype(jnp.float32)
    o_ref[...] = (1.0 / (1.0 + jnp.exp(-y))).astype(o_ref.dtype)


@functools.partial(jax.jit, static_argnames=("block_batch",))
def acc_discriminator_forward(x, w1, b1, w2, b2, *, block_batch=512):
    """x: any shape reshapable to (-1, 4608).  Returns (B, 1) float32.

    Weights are stored transposed vs. torch: w1 (4608, 128), w2 (128, 1).
    block_batch: batch tile upper bound.  512 is safe everywhere; 1024-2048 is
    recommended on v7x (fits the 48 MiB scoped-VMEM limit set below).
    """
    x2d = x.reshape(-1, IN_FEATURES)
    B = x2d.shape[0]

    # Ragged-tail pad only (multiple of 16 rows).  No dtype cast here — the
    # bf16 downcast happens in-vreg inside the kernel.  When B % 16 == 0 this
    # wrapper does zero HBM work on x.
    B_pad = _round_up(B, 16)
    if B_pad != B:
        x2d = jnp.pad(x2d, ((0, B_pad - B), (0, 0)))

    tm = _choose_tile(B_pad, block_batch)
    n_tiles = B_pad // tm

    # Tiny params: just reshape to 2-D (negligible traffic), keep native dtype.
    b1_2d = b1.reshape(1, HIDDEN)
    w2_row = w2.reshape(1, HIDDEN)          # (128, 1) -> (1, 128)
    b2_2d = b2.reshape(1, OUT)

    flops = 2 * B_pad * IN_FEATURES * HIDDEN + 2 * B_pad * HIDDEN
    transcendentals = B_pad * (HIDDEN + 1)                  # SELU exp + sigmoid exp
    bytes_accessed = (x2d.size * x2d.dtype.itemsize
                      + w1.size * w1.dtype.itemsize
                      + B_pad * OUT * 4)

    out = pl.pallas_call(
        _disc_kernel,
        out_shape=jax.ShapeDtypeStruct((B_pad, OUT), jnp.float32),
        grid=(n_tiles,),
        in_specs=[
            pl.BlockSpec((tm, IN_FEATURES), lambda i: (i, 0)),      # x tile (streamed)
            pl.BlockSpec((IN_FEATURES, HIDDEN), lambda i: (0, 0)),  # W1 (resident)
            pl.BlockSpec((1, HIDDEN), lambda i: (0, 0)),            # b1 (resident)
            pl.BlockSpec((1, HIDDEN), lambda i: (0, 0)),            # w2 row (resident)
            pl.BlockSpec((1, OUT), lambda i: (0, 0)),               # b2 (resident)
        ],
        out_specs=pl.BlockSpec((tm, OUT), lambda i: (i, 0)),
        compiler_params=pltpu.CompilerParams(
            dimension_semantics=("parallel",),      # megacore sharding on v7x
            vmem_limit_bytes=48 * 1024 * 1024,      # room for tm up to ~1024 with f32 x
        ),
        cost_estimate=pl.CostEstimate(
            flops=flops,
            transcendentals=transcendentals,
            bytes_accessed=bytes_accessed,
        ),
    )(x2d, w1, b1_2d, w2_row, b2_2d)

    return out[:B]


def _reference_forward(x, w1, b1, w2, b2):
    x = x.reshape(-1, IN_FEATURES).astype(jnp.float32)
    h = x @ w1 + b1.reshape(1, -1)
    h = SELU_SCALE * jnp.where(h > 0, h, SELU_ALPHA * (jnp.exp(h) - 1.0))
    y = h @ w2 + b2.reshape(1, -1)
    return jax.nn.sigmoid(y)


def init_params(key):
    """Matches AccDiscriminator._initialize_weights: Linear weight ~ N(0, 0.01), bias = 0.
    Weights stored as (in_features, out_features)."""
    k1, k2 = jax.random.split(key)
    w1 = 0.01 * jax.random.normal(k1, (IN_FEATURES, HIDDEN), dtype=jnp.float32)
    b1 = jnp.zeros((HIDDEN,), dtype=jnp.float32)
    w2 = 0.01 * jax.random.normal(k2, (HIDDEN, OUT), dtype=jnp.float32)
    b2 = jnp.zeros((OUT,), dtype=jnp.float32)
    return w1, b1, w2, b2


if __name__ == "__main__":
    key = jax.random.PRNGKey(0)
    pkey, xkey = jax.random.split(key)

    w1, b1, w2, b2 = init_params(pkey)

    # Small batch; input shaped like the module expects (reshapable to (-1, 256*18)).
    B = 2
    x = jax.random.normal(xkey, (B, 256, 18), dtype=jnp.float32)

    out = acc_discriminator_forward(x, w1, b1, w2, b2)
    out = jax.block_until_ready(out)

    ref = _reference_forward(x, w1, b1, w2, b2)
    assert out.shape == (B, 1), out.shape
    # bf16 MXU matmul with f32 accumulation over K=4608 -> loosened tolerance.
    assert jnp.allclose(out, ref, atol=5e-3, rtol=0.0), (out, ref)

    print("KERNEL_OK")
</pallas_src>

<mosaic_0001>
module attributes {stable_mosaic.version = 11 : i64} {
  func.func @_disc_kernel(%arg0: i32, %arg1: memref<16x4608xf32, #tpu.memory_space<vmem>>, %arg2: memref<4608x128xf32, #tpu.memory_space<vmem>>, %arg3: memref<1x128xf32, #tpu.memory_space<vmem>>, %arg4: memref<1x128xf32, #tpu.memory_space<vmem>>, %arg5: memref<1x1xf32, #tpu.memory_space<vmem>>, %arg6: memref<16x1xf32, #tpu.memory_space<vmem>>) attributes {dimension_semantics = [#tpu.dimension_semantics<parallel>], iteration_bounds = array<i64: 1>, scalar_prefetch = 0 : i64, scratch_operands = 0 : i64, tpu.core_type = #tpu.core_type<tc>, window_params = [{transform_indices = @transform_0, window_bounds = array<i64: 16, 4608>}, {pipeline_mode = #tpu.pipeline_mode<synchronous>, transform_indices = @transform_1, window_bounds = array<i64: 4608, 128>}, {pipeline_mode = #tpu.pipeline_mode<synchronous>, transform_indices = @transform_2, window_bounds = array<i64: 1, 128>}, {pipeline_mode = #tpu.pipeline_mode<synchronous>, transform_indices = @transform_3, window_bounds = array<i64: 1, 128>}, {pipeline_mode = #tpu.pipeline_mode<synchronous>, transform_indices = @transform_4, window_bounds = array<i64: 1, 1>}, {transform_indices = @transform_5, window_bounds = array<i64: 16, 1>}]} {
    %c0 = arith.constant 0 : index
    %c0_0 = arith.constant 0 : index
    %0 = vector.load %arg1[%c0, %c0_0] : memref<16x4608xf32, #tpu.memory_space<vmem>>, vector<16x4608xf32>
    %1 = arith.truncf %0 : vector<16x4608xf32> to vector<16x4608xbf16>
    %c0_1 = arith.constant 0 : index
    %c0_2 = arith.constant 0 : index
    %2 = vector.load %arg2[%c0_1, %c0_2] : memref<4608x128xf32, #tpu.memory_space<vmem>>, vector<4608x128xf32>
    %3 = arith.truncf %2 : vector<4608x128xf32> to vector<4608x128xbf16>
    %cst = arith.constant dense<0.000000e+00> : vector<16x128xf32>
    %4 = tpu.matmul %1, %3, %cst {dimension_numbers = #tpu.dot_dimension_numbers<[1], [0], [0], [1], [0, 0, 1, 1], [], []>} : vector<16x4608xbf16>, vector<4608x128xbf16>, vector<16x128xf32> -> vector<16x128xf32>
    %c0_3 = arith.constant 0 : index
    %c0_4 = arith.constant 0 : index
    %5 = vector.load %arg3[%c0_3, %c0_4] : memref<1x128xf32, #tpu.memory_space<vmem>>, vector<1x128xf32>
    %6 = vector.broadcast %5 : vector<1x128xf32> to vector<16x128xf32>
    %7 = arith.addf %4, %6 : vector<16x128xf32>
    %cst_5 = arith.constant 0.000000e+00 : f32
    %8 = vector.broadcast %cst_5 : f32 to vector<16x128xf32>
    %9 = arith.cmpf ogt, %7, %8 : vector<16x128xf32>
    %10 = math.exp %7 : vector<16x128xf32>
    %cst_6 = arith.constant 1.000000e+00 : f32
    %11 = vector.broadcast %cst_6 : f32 to vector<16x128xf32>
    %12 = arith.subf %10, %11 : vector<16x128xf32>
    %cst_7 = arith.constant 1.67326319 : f32
    %13 = vector.broadcast %cst_7 : f32 to vector<16x128xf32>
    %14 = arith.mulf %13, %12 : vector<16x128xf32>
    %15 = arith.select %9, %7, %14 : vector<16x128xi1>, vector<16x128xf32>
    %cst_8 = arith.constant 1.05070102 : f32
    %16 = vector.broadcast %cst_8 : f32 to vector<16x128xf32>
    %17 = arith.mulf %16, %15 : vector<16x128xf32>
    %c0_9 = arith.constant 0 : index
    %c0_10 = arith.constant 0 : index
    %18 = vector.load %arg4[%c0_9, %c0_10] : memref<1x128xf32, #tpu.memory_space<vmem>>, vector<1x128xf32>
    %19 = vector.broadcast %18 : vector<1x128xf32> to vector<16x128xf32>
    %20 = arith.mulf %17, %19 : vector<16x128xf32>
    %cst_11 = arith.constant dense<0.000000e+00> : vector<16xf32>
    %21 = vector.multi_reduction <add>, %20, %cst_11 [1] : vector<16x128xf32> to vector<16xf32>
    %22 = vector.shape_cast %21 : vector<16xf32> to vector<16x1xf32>
    %c0_12 = arith.constant 0 : index
    %c0_13 = arith.constant 0 : index
    %23 = vector.load %arg5[%c0_12, %c0_13] : memref<1x1xf32, #tpu.memory_space<vmem>>, vector<1x1xf32>
    %24 = vector.broadcast %23 : vector<1x1xf32> to vector<16x1xf32>
    %25 = arith.addf %22, %24 : vector<16x1xf32>
    %cst_14 = arith.constant 0.000000e+00 : f32
    %26 = vector.broadcast %cst_14 : f32 to vector<16x1xf32>
    %27 = arith.subf %26, %25 : vector<16x1xf32>
    %28 = math.exp %27 : vector<16x1xf32>
    %cst_15 = arith.constant 1.000000e+00 : f32
    %29 = vector.broadcast %cst_15 : f32 to vector<16x1xf32>
    %30 = arith.addf %29, %28 : vector<16x1xf32>
    %cst_16 = arith.constant 1.000000e+00 : f32
    %31 = vector.broadcast %cst_16 : f32 to vector<16x1xf32>
    %32 = arith.divf %31, %30 : vector<16x1xf32>
    %c0_17 = arith.constant 0 : index
    %c0_18 = arith.constant 0 : index
    %33 = vector.load %arg6[%c0_17, %c0_18] : memref<16x1xf32, #tpu.memory_space<vmem>>, vector<16x1xf32>
    tpu.vector_store %arg6[%c0_17, %c0_18], %32 {strides = array<i32>} : memref<16x1xf32, #tpu.memory_space<vmem>>, vector<16x1xf32>,
    return
  }
  func.func @transform_0(%arg0: i32) -> (i32, i32) {
    %c0_i32 = arith.constant 0 : i32
    %c0_i32_0 = arith.constant 0 : i32
    return %arg0, %c0_i32 : i32, i32
  }
  func.func @transform_1(%arg0: i32) -> (i32, i32) {
    %c0_i32 = arith.constant 0 : i32
    %c0_i32_0 = arith.constant 0 : i32
    %c0_i32_1 = arith.constant 0 : i32
    return %c0_i32, %c0_i32_0 : i32, i32
  }
  func.func @transform_2(%arg0: i32) -> (i32, i32) {
    %c0_i32 = arith.constant 0 : i32
    %c0_i32_0 = arith.constant 0 : i32
    %c0_i32_1 = arith.constant 0 : i32
    return %c0_i32, %c0_i32_0 : i32, i32
  }
  func.func @transform_3(%arg0: i32) -> (i32, i32) {
    %c0_i32 = arith.constant 0 : i32
    %c0_i32_0 = arith.constant 0 : i32
    %c0_i32_1 = arith.constant 0 : i32
    return %c0_i32, %c0_i32_0 : i32, i32
  }
  func.func @transform_4(%arg0: i32) -> (i32, i32) {
    %c0_i32 = arith.constant 0 : i32
    %c0_i32_0 = arith.constant 0 : i32
    %c0_i32_1 = arith.constant 0 : i32
    return %c0_i32, %c0_i32_0 : i32, i32
  }
  func.func @transform_5(%arg0: i32) -> (i32, i32) {
    %c0_i32 = arith.constant 0 : i32
    %c0_i32_0 = arith.constant 0 : i32
    return %arg0, %c0_i32 : i32, i32
  }
}

</mosaic_0001>

<bundles_post_ra>
// kernel: acc_discriminator_forward.1
= control target key start
LH: loop header
LB: loop body
LE: loop exit
PB: predicated region body
PF: predicated region fallthrough
CT: control target
= control target key end

     0   :  { %s2631_s0 = inlined_call_operand.vmem [shape: f32[16,4608], index: 0, kind: input, shape index: {}]   ;;  %s2632_s1 = inlined_call_operand.hbm [shape: f32[4608,128], index: 1, kind: input, shape index: {}]   ;;  %s2633_s2 = inlined_call_operand.hbm [shape: f32[1,128], index: 2, kind: input, shape index: {}]   ;;  %s2634_s3 = inlined_call_operand.hbm [shape: f32[1,128], index: 3, kind: input, shape index: {}]   ;;  %s2635_s4 = inlined_call_operand.<no memory space> [shape: f32[1,1], index: 4, kind: input, shape index: {}]   ;;  %s2636_s5 = inlined_call_operand.vmem [shape: f32[16,1], index: 5, kind: output, shape index: {}]  }
   0x1   :  { %v10_v0 = vstv %s2635_s4 }
   0x2   :  { %11 = vst [vmem:[#allocation2] sm:$0x1] %v10_v0 }
   0x3   :  { %12 = vsyncpa [#allocation4], 0 }
   0x4   :  { %13 = vsyncpa [#allocation6], 0  ;;  %s2322_s20 = smov [#allocation5]   ;;  %s2323_s22 = smov [#allocation3]  }
   0x5   :  { %s34_s21 = sshll.u32 %s2322_s20, 4  ;;  %s21_s23 = sshll.u32 %s2323_s22, 4  ;;  %s35_s21 = int_to_ptr.vmem [resolvable:$true] %s34_s21  ;;  %s2360_s23 = int_to_ptr.vmem [resolvable:$true] %s21_s23 }
   0x6   :  { %s2252_s26 = scalar_lea.hbm %s2633_s2, 16 }
   0x7   :  { %p2253_p0 = scmp.ne.s32.totalorder %s2633_s2, %s2252_s26  ;;  %p2256_p1 = scmp.lt.u32.totalorder %s2252_s26, %s2633_s2 }
   0x9   :  { %p2258_p2 = pnand %p2256_p1, %p2253_p0 }
   0xb   :  { %2261 = shalt.err (!%p2258_p2)
}
   0xc   :  { %s2262_s30 = scalar_lea.vmem %s35_s21, 16  ;;  %s2266_s6 = scalar_lea.vmem %s35_s21, 32 }
   0xd   :  { %p2263_p3 = scmp.ne.s32.totalorder %s35_s21, %s2262_s30  ;;  %p2267_p4 = scmp.lt.s32.totalorder %s35_s21, %s35_s21 }
   0xe   :  { %p2268_p5 = scmp.lt.s32.totalorder %s2266_s6, %s2262_s30 }
  0x10   :  { %p2269_p6 = por %p2268_p5, %p2267_p4 }
  0x12   :  { %p2270_p7 = pnand %p2269_p6, %p2263_p3 }
  0x14   :  { %2273 = shalt.err (!%p2270_p7)
}
  0x15   :  { %37 = dma.hbm_to_vmem [thread:$0]  %s2633_s2, 16, %s35_s21, [#allocation6]  }
  0x16   :  { %s2274_s11 = scalar_lea.hbm %s2632_s1, 73728 }
  0x17   :  { %p2275_p8 = scmp.ne.s32.totalorder %s2632_s1, %s2274_s11  ;;  %p2278_p9 = scmp.lt.u32.totalorder %s2274_s11, %s2632_s1 }
  0x19   :  { %p2280_p10 = pnand %p2278_p9, %p2275_p8 }
  0x1b   :  { %2283 = shalt.err (!%p2280_p10)
}
  0x1c   :  { %s2284_s16 = scalar_lea.vmem %s2360_s23, 73728  ;;  %p2289_p12 = scmp.lt.s32.totalorder %s2360_s23, %s2360_s23 }
  0x1d   :  { %p2285_p11 = scmp.ne.s32.totalorder %s2360_s23, %s2284_s16  ;;  %p2290_p13 = scmp.lt.s32.totalorder %s2284_s16, %s2284_s16 }
  0x1f   :  { %p2291_p0 = por %p2290_p13, %p2289_p12 }
  0x21   :  { %p2292_p1 = pnand %p2291_p0, %p2285_p11 }
  0x23   :  { %2295 = shalt.err (!%p2292_p1)
}
  0x24   :  { %s2324_s2 = smov 128   ;;  %s2325_s17 = smov 8  }
  0x25   :  { %27 = dma.hbm_to_vmem [thread:$0]  %s2632_s1, 73728, %s2360_s23, [#allocation4], %s2324_s2, %s2324_s2, %s2325_s17  }
  0x26   :  { %s2326_s20 = smov [#allocation7]   ;;  %s2296_s25 = scalar_lea.hbm %s2634_s3, 16 }
  0x27   :  { %s44_s21 = sshll.u32 %s2326_s20, 4  ;;  %p2297_p2 = scmp.ne.s32.totalorder %s2634_s3, %s2296_s25  ;;  %s45_s21 = int_to_ptr.vmem [resolvable:$true] %s44_s21 }
  0x28   :  { %p2300_p3 = scmp.lt.u32.totalorder %s2296_s25, %s2634_s3 }
  0x2a   :  { %p2302_p4 = pnand %p2300_p3, %p2297_p2 }
  0x2c   :  { %2305 = shalt.err (!%p2302_p4)
}
  0x2d   :  { %s2306_s4 = scalar_lea.vmem %s45_s21, 16  ;;  %s2310_s1 = scalar_lea.vmem %s45_s21, 32 }
  0x2e   :  { %p2307_p5 = scmp.ne.s32.totalorder %s45_s21, %s2306_s4  ;;  %p2311_p6 = scmp.lt.s32.totalorder %s45_s21, %s45_s21 }
  0x2f   :  { %p2312_p7 = scmp.lt.s32.totalorder %s2310_s1, %s2306_s4 }
  0x31   :  { %p2313_p8 = por %p2312_p7, %p2311_p6 }
  0x33   :  { %p2314_p9 = pnand %p2313_p8, %p2307_p5 }
  0x35   :  { %2317 = shalt.err (!%p2314_p9)
}
  0x36   :  { %47 = dma.hbm_to_vmem [thread:$0]  %s2634_s3, 16, %s45_s21, [#allocation6]  }
  0x37   :  { %2318 = dma.done.wait [#allocation4], 73728  }
  0x38   :  { %2319 = vsyncadd [#allocation4], 4294893568 }
  0x39   :  { %2320 = dma.done.wait [#allocation6], 32  }
  0x3a   :  { %2321 = vsyncadd [#allocation6], 4294967264  ;;  %v184_v1 = vld [vmem:[#allocation3 + $0x80] sm:$0xff]  ;;  %v185_v2 = vld [vmem:[#allocation3 + $0x88] sm:$0xff]  ;;  %vm1825_vm2 = vcmask 7168  }
  0x3b   :  { %v216_v3 = vld [vmem:[#allocation3 + $0x180] sm:$0xff]  ;;  %v752_v4 = vpack.c.bf16 %v185_v2, %v184_v1  ;;  %v217_v5 = vld [vmem:[#allocation3 + $0x188] sm:$0xff]  ;;  %v186_v12 = vld [vmem:[#allocation3 + $0x90] sm:$0xff] }
  0x3c   :  { %v168_v6 = vld [vmem:[#allocation3] sm:$0xff]  ;;  %v169_v7 = vld [vmem:[#allocation3 + $0x8] sm:$0xff]  ;;  %v768_v8 = vpack.c.bf16 %v217_v5, %v216_v3  ;;  %v187_v14 = vld [vmem:[#allocation3 + $0x98] sm:$0xff] }
  0x3d   :  { %v744_v9 = vpack.c.bf16 %v169_v7, %v168_v6  ;;  %v200_v10 = vld [vmem:[#allocation3 + $0x100] sm:$0xff]  ;;  %v201_v11 = vld [vmem:[#allocation3 + $0x108] sm:$0xff]  ;;  %1839 = vmatprep.subr.bf16.mxu0 %v752_v4  ;;  %v218_v15 = vld [vmem:[#allocation3 + $0x190] sm:$0xff]  ;;  %v753_v17 = vpack.c.bf16 %v187_v14, %v186_v12 }
  0x3e   :  { %v760_v13 = vpack.c.bf16 %v201_v11, %v200_v10  ;;  %v219_v16 = vld [vmem:[#allocation3 + $0x198] sm:$0xff]  ;;  %1861 = vmatprep.subr.bf16.mxu1 %v768_v8  ;;  %v170_v19 = vld [vmem:[#allocation3 + $0x10] sm:$0xff]  ;;  %v188_v24 = vld [vmem:[#allocation3 + $0xa0] sm:$0xff] }
  0x3f   :  { %1840 = vmatpush3.bf16.msra.mxu0 %v744_v9  ;;  %v769_v18 = vpack.c.bf16 %v219_v16, %v218_v15  ;;  %v171_v20 = vld [vmem:[#allocation3 + $0x18] sm:$0xff]  ;;  %v202_v21 = vld [vmem:[#allocation3 + $0x110] sm:$0xff]  ;;  %v189_v25 = vld [vmem:[#allocation3 + $0xa8] sm:$0xff] }
  0x40   :  { %1862 = vmatpush3.bf16.msra.mxu1 %v760_v13  ;;  %v745_v22 = vpack.c.bf16 %v171_v20, %v170_v19  ;;  %v203_v23 = vld [vmem:[#allocation3 + $0x118] sm:$0xff]  ;;  %1841 = vmatprep.subr.bf16.mxu0 %v753_v17  ;;  %v754_v27 = vpack.c.bf16 %v189_v25, %v188_v24  ;;  %v220_v28 = vld [vmem:[#allocation3 + $0x1a0] sm:$0xff]  ;;  %v221_v29 = vld [vmem:[#allocation3 + $0x1a8] sm:$0xff] }
  0x41   :  { %1863 = vmatprep.subr.bf16.mxu1 %v769_v18  ;;  %v761_v26 = vpack.c.bf16 %v203_v23, %v202_v21  ;;  %v172_v30 = vld [vmem:[#allocation3 + $0x20] sm:$0xff]  ;;  %v770_v31 = vpack.c.bf16 %v221_v29, %v220_v28  ;;  %v173_v32 = vld [vmem:[#allocation3 + $0x28] sm:$0xff]  ;;  %v190_v36 = vld [vmem:[#allocation3 + $0xb0] sm:$0xff] }
  0x42   :  { %v204_v33 = vld [vmem:[#allocation3 + $0x120] sm:$0xff]  ;;  %v205_v34 = vld [vmem:[#allocation3 + $0x128] sm:$0xff]  ;;  %v746_v35 = vpack.c.bf16 %v173_v32, %v172_v30  ;;  %v191_v37 = vld [vmem:[#allocation3 + $0xb8] sm:$0xff] }
  0x43   :  { %1842 = vmatpush3.bf16.msra.mxu0 %v745_v22  ;;  %v222_v38 = vld [vmem:[#allocation3 + $0x1b0] sm:$0xff]  ;;  %v762_v39 = vpack.c.bf16 %v205_v34, %v204_v33  ;;  %v755_v40 = vpack.c.bf16 %v191_v37, %v190_v36  ;;  %v223_v41 = vld [vmem:[#allocation3 + $0x1b8] sm:$0xff]  ;;  %v192_v47 = vld [vmem:[#allocation3 + $0xc0] sm:$0xff] }
  0x44   :  { %1864 = vmatpush3.bf16.msra.mxu1 %v761_v26  ;;  %1843 = vmatprep.subr.bf16.mxu0 %v754_v27  ;;  %v174_v42 = vld [vmem:[#allocation3 + $0x30] sm:$0xff]  ;;  %v175_v43 = vld [vmem:[#allocation3 + $0x38] sm:$0xff]  ;;  %v771_v44 = vpack.c.bf16 %v223_v41, %v222_v38  ;;  %v193_v48 = vld [vmem:[#allocation3 + $0xc8] sm:$0xff] }
  0x45   :  { %1865 = vmatprep.subr.bf16.mxu1 %v770_v31  ;;  %v206_v45 = vld [vmem:[#allocation3 + $0x130] sm:$0xff]  ;;  %v207_v46 = vld [vmem:[#allocation3 + $0x138] sm:$0xff]  ;;  %v224_v49 = vld [vmem:[#allocation3 + $0x1c0] sm:$0xff]  ;;  %v747_v51 = vpack.c.bf16 %v175_v43, %v174_v42  ;;  %v756_v53 = vpack.c.bf16 %v193_v48, %v192_v47 }
  0x46   :  { %v225_v50 = vld [vmem:[#allocation3 + $0x1c8] sm:$0xff]  ;;  %v763_v52 = vpack.c.bf16 %v207_v46, %v206_v45  ;;  %v176_v54 = vld [vmem:[#allocation3 + $0x40] sm:$0xff]  ;;  %v194_v59 = vld [vmem:[#allocation3 + $0xd0] sm:$0xff] }
  0x47   :  { %1844 = vmatpush3.bf16.msra.mxu0 %v746_v35  ;;  %v177_v55 = vld [vmem:[#allocation3 + $0x48] sm:$0xff]  ;;  %v208_v56 = vld [vmem:[#allocation3 + $0x140] sm:$0xff]  ;;  %v772_v57 = vpack.c.bf16 %v225_v50, %v224_v49  ;;  %v195_v60 = vld [vmem:[#allocation3 + $0xd8] sm:$0xff] }
  0x48   :  { %1866 = vmatpush3.bf16.msra.mxu1 %v762_v39  ;;  %1845 = vmatprep.subr.bf16.mxu0 %v755_v40  ;;  %v209_v58 = vld [vmem:[#allocation3 + $0x148] sm:$0xff]  ;;  %v226_v61 = vld [vmem:[#allocation3 + $0x1d0] sm:$0xff]  ;;  %v227_v62 = vld [vmem:[#allocation3 + $0x1d8] sm:$0xff]  ;;  %v748_v63 = vpack.c.bf16 %v177_v55, %v176_v54  ;;  %v757_v1 = vpack.c.bf16 %v195_v60, %v194_v59 }
  0x49   :  { %1867 = vmatprep.subr.bf16.mxu1 %v771_v44  ;;  %v764_v0 = vpack.c.bf16 %v209_v58, %v208_v56  ;;  %v178_v2 = vld [vmem:[#allocation3 + $0x50] sm:$0xff]  ;;  %v179_v3 = vld [vmem:[#allocation3 + $0x58] sm:$0xff]  ;;  %v773_v5 = vpack.c.bf16 %v227_v62, %v226_v61  ;;  %v196_v7 = vld [vmem:[#allocation3 + $0xe0] sm:$0xff] }
  0x4a   :  { %v210_v4 = vld [vmem:[#allocation3 + $0x150] sm:$0xff]  ;;  %v211_v6 = vld [vmem:[#allocation3 + $0x158] sm:$0xff]  ;;  %v197_v8 = vld [vmem:[#allocation3 + $0xe8] sm:$0xff]  ;;  %v749_v12 = vpack.c.bf16 %v179_v3, %v178_v2 }
  0x4b   :  { %1846 = vmatpush3.bf16.msra.mxu0 %v747_v51  ;;  %v228_v9 = vld [vmem:[#allocation3 + $0x1e0] sm:$0xff]  ;;  %v229_v10 = vld [vmem:[#allocation3 + $0x1e8] sm:$0xff]  ;;  %v765_v16 = vpack.c.bf16 %v211_v6, %v210_v4  ;;  %v758_v17 = vpack.c.bf16 %v197_v8, %v196_v7  ;;  %v198_v18 = vld [vmem:[#allocation3 + $0xf0] sm:$0xff] }
  0x4c   :  { %1868 = vmatpush3.bf16.msra.mxu1 %v763_v52  ;;  %1847 = vmatprep.subr.bf16.mxu0 %v756_v53  ;;  %v180_v11 = vld [vmem:[#allocation3 + $0x60] sm:$0xff]  ;;  %v181_v13 = vld [vmem:[#allocation3 + $0x68] sm:$0xff]  ;;  %v774_v21 = vpack.c.bf16 %v229_v10, %v228_v9  ;;  %v199_v22 = vld [vmem:[#allocation3 + $0xf8] sm:$0xff] }
  0x4d   :  { %1869 = vmatprep.subr.bf16.mxu1 %v772_v57  ;;  %v212_v14 = vld [vmem:[#allocation3 + $0x160] sm:$0xff]  ;;  %v213_v15 = vld [vmem:[#allocation3 + $0x168] sm:$0xff]  ;;  %v63_v24 = vld [vmem:[%s2631_s0 + $0x18] sm:$0xff]  ;;  %v750_v29 = vpack.c.bf16 %v181_v13, %v180_v11  ;;  %v759_v31 = vpack.c.bf16 %v199_v22, %v198_v18 }
  0x4e   :  { %v61_v19 = vld [vmem:[%s2631_s0 + $0x8] sm:$0xff]  ;;  %v99_v25 = vld [vmem:[%s2631_s0 + $0x138] sm:$0xff]  ;;  %v766_v30 = vpack.c.bf16 %v213_v15, %v212_v14  ;;  %v60_v39 = vld [vmem:[%s2631_s0] sm:$0xff] }
  0x4f   :  { %1848 = vmatpush3.bf16.msra.mxu0 %v748_v63  ;;  %v97_v20 = vld [vmem:[%s2631_s0 + $0x128] sm:$0xff]  ;;  %v230_v26 = vld [vmem:[#allocation3 + $0x1f0] sm:$0xff]  ;;  %v231_v27 = vld [vmem:[#allocation3 + $0x1f8] sm:$0xff]  ;;  %v135_v28 = vpack.c.bf16 %v99_v25, %v63_v24 }
  0x50   :  { %1870 = vmatpush3.bf16.msra.mxu1 %v764_v0  ;;  %1849 = vmatprep.subr.bf16.mxu0 %v757_v1  ;;  %v133_v23 = vpack.c.bf16 %v97_v20, %v61_v19  ;;  %v182_v32 = vld [vmem:[#allocation3 + $0x70] sm:$0xff]  ;;  %v183_v33 = vld [vmem:[#allocation3 + $0x78] sm:$0xff]  ;;  %v775_v35 = vpack.c.bf16 %v231_v27, %v230_v26  ;;  %v248_v37 = vld [vmem:[#allocation3 + $0x280] sm:$0xff] }
  0x51   :  { %1871 = vmatprep.subr.bf16.mxu1 %v773_v5  ;;  %v214_v34 = vld [vmem:[#allocation3 + $0x170] sm:$0xff]  ;;  %v215_v36 = vld [vmem:[#allocation3 + $0x178] sm:$0xff]  ;;  %1112 = vmatprep.mubr.bf16.mxu1 %v135_v28  ;;  %v249_v38 = vld [vmem:[#allocation3 + $0x288] sm:$0xff]  ;;  %v751_v42 = vpack.c.bf16 %v183_v33, %v182_v32 }
  0x52   :  { %1071 = vmatprep.mubr.bf16.mxu0 %v133_v23  ;;  %v280_v40 = vld [vmem:[#allocation3 + $0x380] sm:$0xff]  ;;  %v281_v41 = vld [vmem:[#allocation3 + $0x388] sm:$0xff]  ;;  %v767_v46 = vpack.c.bf16 %v215_v36, %v214_v34  ;;  %v784_v47 = vpack.c.bf16 %v249_v38, %v248_v37  ;;  %v250_v53 = vld [vmem:[#allocation3 + $0x290] sm:$0xff] }
  0x53   :  { %1850 = vmatpush3.bf16.msra.mxu0 %v749_v12  ;;  %v96_v43 = vld [vmem:[%s2631_s0 + $0x120] sm:$0xff]  ;;  %v62_v44 = vld [vmem:[%s2631_s0 + $0x10] sm:$0xff]  ;;  %v800_v51 = vpack.c.bf16 %v281_v41, %v280_v40  ;;  %v101_v40 = vld [vmem:[%s2631_s0 + $0x148] sm:$0xff] }
  0x54   :  { %1872 = vmatpush3.bf16.msra.mxu1 %v765_v16  ;;  %1851 = vmatprep.subr.bf16.mxu0 %v758_v17  ;;  %v98_v45 = vld [vmem:[%s2631_s0 + $0x130] sm:$0xff]  ;;  %v232_v48 = vld [vmem:[#allocation3 + $0x200] sm:$0xff]  ;;  %v251_v54 = vld [vmem:[#allocation3 + $0x298] sm:$0xff]  ;;  %v132_v55 = vpack.c.bf16 %v96_v43, %v60_v39 }
  0x55   :  { %1873 = vmatprep.subr.bf16.mxu1 %v774_v21  ;;  %v233_v49 = vld [vmem:[#allocation3 + $0x208] sm:$0xff]  ;;  %v264_v50 = vld [vmem:[#allocation3 + $0x300] sm:$0xff]  ;;  %v282_v56 = vld [vmem:[#allocation3 + $0x390] sm:$0xff]  ;;  %v134_v58 = vpack.c.bf16 %v98_v45, %v62_v44  ;;  %v785_v61 = vpack.c.bf16 %v251_v54, %v250_v53 }
  0x56   :  { %v265_v52 = vld [vmem:[#allocation3 + $0x308] sm:$0xff]  ;;  %v283_v57 = vld [vmem:[#allocation3 + $0x398] sm:$0xff]  ;;  %v776_v59 = vpack.c.bf16 %v233_v49, %v232_v48  ;;  %v234_v62 = vld [vmem:[#allocation3 + $0x210] sm:$0xff] }
  0x57   :  { %1852 = vmatpush3.bf16.msra.mxu0 %v750_v29  ;;  %v792_v60 = vpack.c.bf16 %v265_v52, %v264_v50  ;;  %v235_v63 = vld [vmem:[#allocation3 + $0x218] sm:$0xff]  ;;  %v266_v0 = vld [vmem:[#allocation3 + $0x310] sm:$0xff]  ;;  %v801_v1 = vpack.c.bf16 %v283_v57, %v282_v56  ;;  %v252_v3 = vld [vmem:[#allocation3 + $0x2a0] sm:$0xff] }
  0x58   :  { %1874 = vmatpush3.bf16.msra.mxu1 %v766_v30  ;;  %1853 = vmatprep.subr.bf16.mxu0 %v759_v31  ;;  %v267_v2 = vld [vmem:[#allocation3 + $0x318] sm:$0xff]  ;;  %v253_v4 = vld [vmem:[#allocation3 + $0x2a8] sm:$0xff]  ;;  %v284_v5 = vld [vmem:[#allocation3 + $0x3a0] sm:$0xff]  ;;  %v777_v7 = vpack.c.bf16 %v235_v63, %v234_v62 }
  0x59   :  { %1875 = vmatprep.subr.bf16.mxu1 %v775_v35  ;;  %v285_v6 = vld [vmem:[#allocation3 + $0x3a8] sm:$0xff]  ;;  %v793_v8 = vpack.c.bf16 %v267_v2, %v266_v0  ;;  %v786_v9 = vpack.c.bf16 %v253_v4, %v252_v3  ;;  %v236_v10 = vld [vmem:[#allocation3 + $0x220] sm:$0xff]  ;;  %v254_v15 = vld [vmem:[#allocation3 + $0x2b0] sm:$0xff] }
  0x5a   :  { %v237_v11 = vld [vmem:[#allocation3 + $0x228] sm:$0xff]  ;;  %v268_v12 = vld [vmem:[#allocation3 + $0x320] sm:$0xff]  ;;  %v802_v13 = vpack.c.bf16 %v285_v6, %v284_v5  ;;  %v255_v16 = vld [vmem:[#allocation3 + $0x2b8] sm:$0xff] }
  0x5b   :  { %1854 = vmatpush3.bf16.msra.mxu0 %v751_v42  ;;  %v269_v14 = vld [vmem:[#allocation3 + $0x328] sm:$0xff]  ;;  %v286_v17 = vld [vmem:[#allocation3 + $0x3b0] sm:$0xff]  ;;  %v287_v18 = vld [vmem:[#allocation3 + $0x3b8] sm:$0xff]  ;;  %v778_v19 = vpack.c.bf16 %v237_v11, %v236_v10  ;;  %v787_v21 = vpack.c.bf16 %v255_v16, %v254_v15 }
  0x5c   :  { %1876 = vmatpush3.bf16.msra.mxu1 %v767_v46  ;;  %1883 = vmatprep.subr.bf16.mxu0 %v784_v47  ;;  %v794_v20 = vpack.c.bf16 %v269_v14, %v268_v12  ;;  %v238_v22 = vld [vmem:[#allocation3 + $0x230] sm:$0xff]  ;;  %v239_v23 = vld [vmem:[#allocation3 + $0x238] sm:$0xff]  ;;  %v803_v25 = vpack.c.bf16 %v287_v18, %v286_v17  ;;  %v256_v27 = vld [vmem:[#allocation3 + $0x2c0] sm:$0xff] }
  0x5d   :  { %1905 = vmatprep.subr.bf16.mxu1 %v800_v51  ;;  %v270_v24 = vld [vmem:[#allocation3 + $0x330] sm:$0xff]  ;;  %v271_v26 = vld [vmem:[#allocation3 + $0x338] sm:$0xff]  ;;  %v257_v28 = vld [vmem:[#allocation3 + $0x2c8] sm:$0xff]  ;;  %v779_v32 = vpack.c.bf16 %v239_v23, %v238_v22 }
  0x5e   :  { %1072 = vmatmul.mubr.bf16.vlgmr.msra.gmra.mrb[0].mxu0 %v132_v55  ;;  %v288_v29 = vld [vmem:[#allocation3 + $0x3c0] sm:$0xff]  ;;  %v289_v30 = vld [vmem:[#allocation3 + $0x3c8] sm:$0xff]  ;;  %v795_v36 = vpack.c.bf16 %v271_v26, %v270_v24  ;;  %v788_v37 = vpack.c.bf16 %v257_v28, %v256_v27  ;;  %v258_v38 = vld [vmem:[#allocation3 + $0x2d0] sm:$0xff] }
  0x5f   :  { %1113 = vmatmul.mubr.bf16.vlgmr.msra.gmra.mrb[0].mxu1 %v134_v58  ;;  %1884 = vmatpush3.bf16.msra.mxu0 %v776_v59  ;;  %v240_v31 = vld [vmem:[#allocation3 + $0x240] sm:$0xff]  ;;  %v241_v33 = vld [vmem:[#allocation3 + $0x248] sm:$0xff]  ;;  %v804_v41 = vpack.c.bf16 %v289_v30, %v288_v29  ;;  %v259_v42 = vld [vmem:[#allocation3 + $0x2d8] sm:$0xff] }
  0x60   :  { %1906 = vmatpush3.bf16.msra.mxu1 %v792_v60  ;;  %1885 = vmatprep.subr.bf16.mxu0 %v785_v61  ;;  %v272_v34 = vld [vmem:[#allocation3 + $0x340] sm:$0xff]  ;;  %v273_v35 = vld [vmem:[#allocation3 + $0x348] sm:$0xff]  ;;  %v67_v44 = vld [vmem:[%s2631_s0 + $0x38] sm:$0xff]  ;;  %v780_v49 = vpack.c.bf16 %v241_v33, %v240_v31  ;;  %v789_v51 = vpack.c.bf16 %v259_v42, %v258_v38 }
  0x61   :  { %1907 = vmatprep.subr.bf16.mxu1 %v801_v1  ;;  %v65_v39 = vld [vmem:[%s2631_s0 + $0x28] sm:$0xff]  ;;  %v103_v45 = vld [vmem:[%s2631_s0 + $0x158] sm:$0xff]  ;;  %v796_v50 = vpack.c.bf16 %v273_v35, %v272_v34  ;;  %v100_v23 = vld [vmem:[%s2631_s0 + $0x140] sm:$0xff] }
  0x62   :  { %v137_v43 = vpack.c.bf16 %v101_v40, %v65_v39  ;;  %v290_v46 = vld [vmem:[#allocation3 + $0x3d0] sm:$0xff]  ;;  %v291_v47 = vld [vmem:[#allocation3 + $0x3d8] sm:$0xff]  ;;  %v139_v48 = vpack.c.bf16 %v103_v45, %v67_v44  ;;  %v260_v57 = vld [vmem:[#allocation3 + $0x2e0] sm:$0xff] }
  0x63   :  { %1886 = vmatpush3.bf16.msra.mxu0 %v777_v7  ;;  %v242_v52 = vld [vmem:[#allocation3 + $0x250] sm:$0xff]  ;;  %v243_v53 = vld [vmem:[#allocation3 + $0x258] sm:$0xff]  ;;  %v805_v55 = vpack.c.bf16 %v291_v47, %v290_v46  ;;  %v261_v58 = vld [vmem:[#allocation3 + $0x2e8] sm:$0xff] }
  0x64   :  { %1908 = vmatpush3.bf16.msra.mxu1 %v793_v8  ;;  %1887 = vmatprep.subr.bf16.mxu0 %v786_v9  ;;  %v274_v54 = vld [vmem:[#allocation3 + $0x350] sm:$0xff]  ;;  %v275_v56 = vld [vmem:[#allocation3 + $0x358] sm:$0xff]  ;;  %v292_v59 = vld [vmem:[#allocation3 + $0x3e0] sm:$0xff]  ;;  %v781_v61 = vpack.c.bf16 %v243_v53, %v242_v52  ;;  %v790_v63 = vpack.c.bf16 %v261_v58, %v260_v57 }
  0x65   :  { %1909 = vmatprep.subr.bf16.mxu1 %v802_v13  ;;  %1153 = vmatprep.mubr.bf16.mxu0 %v137_v43  ;;  %v293_v60 = vld [vmem:[#allocation3 + $0x3e8] sm:$0xff]  ;;  %v797_v62 = vpack.c.bf16 %v275_v56, %v274_v54  ;;  %v244_v0 = vld [vmem:[#allocation3 + $0x260] sm:$0xff]  ;;  %v262_v5 = vld [vmem:[#allocation3 + $0x2f0] sm:$0xff] }
  0x66   :  { %1194 = vmatprep.mubr.bf16.mxu1 %v139_v48  ;;  %v245_v1 = vld [vmem:[#allocation3 + $0x268] sm:$0xff]  ;;  %v276_v2 = vld [vmem:[#allocation3 + $0x360] sm:$0xff]  ;;  %v806_v3 = vpack.c.bf16 %v293_v60, %v292_v59  ;;  %v263_v6 = vld [vmem:[#allocation3 + $0x2f8] sm:$0xff] }
  0x67   :  { %1888 = vmatpush3.bf16.msra.mxu0 %v778_v19  ;;  %v277_v4 = vld [vmem:[#allocation3 + $0x368] sm:$0xff]  ;;  %v294_v7 = vld [vmem:[#allocation3 + $0x3f0] sm:$0xff]  ;;  %v295_v8 = vld [vmem:[#allocation3 + $0x3f8] sm:$0xff]  ;;  %v782_v9 = vpack.c.bf16 %v245_v1, %v244_v0  ;;  %v791_v11 = vpack.c.bf16 %v263_v6, %v262_v5 }
  0x68   :  { %1910 = vmatpush3.bf16.msra.mxu1 %v794_v20  ;;  %1889 = vmatprep.subr.bf16.mxu0 %v787_v21  ;;  %v798_v10 = vpack.c.bf16 %v277_v4, %v276_v2  ;;  %v246_v12 = vld [vmem:[#allocation3 + $0x270] sm:$0xff]  ;;  %v247_v13 = vld [vmem:[#allocation3 + $0x278] sm:$0xff]  ;;  %v807_v15 = vpack.c.bf16 %v295_v8, %v294_v7  ;;  %v312_v17 = vld [vmem:[#allocation3 + $0x480] sm:$0xff] }
  0x69   :  { %1911 = vmatprep.subr.bf16.mxu1 %v803_v25  ;;  %v278_v14 = vld [vmem:[#allocation3 + $0x370] sm:$0xff]  ;;  %v279_v16 = vld [vmem:[#allocation3 + $0x378] sm:$0xff]  ;;  %v313_v18 = vld [vmem:[#allocation3 + $0x488] sm:$0xff]  ;;  %v783_v22 = vpack.c.bf16 %v247_v13, %v246_v12 }
  0x6a   :  { %v64_v19 = vld [vmem:[%s2631_s0 + $0x20] sm:$0xff]  ;;  %v345_v21 = vld [vmem:[#allocation3 + $0x588] sm:$0xff]  ;;  %v799_v26 = vpack.c.bf16 %v279_v16, %v278_v14  ;;  %v816_v27 = vpack.c.bf16 %v313_v18, %v312_v17  ;;  %v314_v33 = vld [vmem:[#allocation3 + $0x490] sm:$0xff] }
  0x6b   :  { %1890 = vmatpush3.bf16.msra.mxu0 %v779_v32  ;;  %v344_v20 = vld [vmem:[#allocation3 + $0x580] sm:$0xff]  ;;  %v66_v24 = vld [vmem:[%s2631_s0 + $0x30] sm:$0xff]  ;;  %v315_v34 = vld [vmem:[#allocation3 + $0x498] sm:$0xff]  ;;  %v136_v35 = vpack.c.bf16 %v100_v23, %v64_v19 }
  0x6c   :  { %1912 = vmatpush3.bf16.msra.mxu1 %v795_v36  ;;  %1891 = vmatprep.subr.bf16.mxu0 %v788_v37  ;;  %v102_v25 = vld [vmem:[%s2631_s0 + $0x150] sm:$0xff]  ;;  %v296_v28 = vld [vmem:[#allocation3 + $0x400] sm:$0xff]  ;;  %v832_v31 = vpack.c.bf16 %v345_v21, %v344_v20  ;;  %v347_v37 = vld [vmem:[#allocation3 + $0x598] sm:$0xff] }
  0x6d   :  { %1913 = vmatprep.subr.bf16.mxu1 %v804_v41  ;;  %v297_v29 = vld [vmem:[#allocation3 + $0x408] sm:$0xff]  ;;  %v328_v30 = vld [vmem:[#allocation3 + $0x500] sm:$0xff]  ;;  %v346_v36 = vld [vmem:[#allocation3 + $0x590] sm:$0xff]  ;;  %v138_v38 = vpack.c.bf16 %v102_v25, %v66_v24  ;;  %v817_v41 = vpack.c.bf16 %v315_v34, %v314_v33 }
  0x6e   :  { %v329_v32 = vld [vmem:[#allocation3 + $0x508] sm:$0xff]  ;;  %v808_v39 = vpack.c.bf16 %v297_v29, %v296_v28  ;;  %v298_v42 = vld [vmem:[#allocation3 + $0x410] sm:$0xff]  ;;  %v299_v43 = vld [vmem:[#allocation3 + $0x418] sm:$0xff]  ;;  %v833_v45 = vpack.c.bf16 %v347_v37, %v346_v36 }
  0x6f   :  { %1892 = vmatpush3.bf16.msra.mxu0 %v780_v49  ;;  %v824_v40 = vpack.c.bf16 %v329_v32, %v328_v30  ;;  %v330_v44 = vld [vmem:[#allocation3 + $0x510] sm:$0xff]  ;;  %v331_v46 = vld [vmem:[#allocation3 + $0x518] sm:$0xff]  ;;  %v316_v47 = vld [vmem:[#allocation3 + $0x4a0] sm:$0xff]  ;;  %v809_v52 = vpack.c.bf16 %v299_v43, %v298_v42 }
  0x70   :  { %1914 = vmatpush3.bf16.msra.mxu1 %v796_v50  ;;  %1893 = vmatprep.subr.bf16.mxu0 %v789_v51  ;;  %v317_v48 = vld [vmem:[#allocation3 + $0x4a8] sm:$0xff]  ;;  %v348_v49 = vld [vmem:[#allocation3 + $0x5a0] sm:$0xff]  ;;  %v825_v56 = vpack.c.bf16 %v331_v46, %v330_v44  ;;  %v318_v58 = vld [vmem:[#allocation3 + $0x4b0] sm:$0xff] }
  0x71   :  { %1915 = vmatprep.subr.bf16.mxu1 %v805_v55  ;;  %v349_v50 = vld [vmem:[#allocation3 + $0x5a8] sm:$0xff]  ;;  %v300_v51 = vld [vmem:[#allocation3 + $0x420] sm:$0xff]  ;;  %v818_v57 = vpack.c.bf16 %v317_v48, %v316_v47  ;;  %v71_v0 = vld [vmem:[%s2631_s0 + $0x58] sm:$0xff] }
  0x72   :  { %v301_v53 = vld [vmem:[#allocation3 + $0x428] sm:$0xff]  ;;  %v332_v54 = vld [vmem:[#allocation3 + $0x520] sm:$0xff]  ;;  %v107_v1 = vld [vmem:[%s2631_s0 + $0x178] sm:$0xff] }
  0x73   :  { %1894 = vmatpush3.bf16.msra.mxu0 %v781_v61  ;;  %v333_v55 = vld [vmem:[#allocation3 + $0x528] sm:$0xff]  ;;  %v834_v61 = vpack.c.bf16 %v349_v50, %v348_v49  ;;  %v350_v2 = vld [vmem:[#allocation3 + $0x5b0] sm:$0xff]  ;;  %v143_v4 = vpack.c.bf16 %v107_v1, %v71_v0  ;;  %v810_v5 = vpack.c.bf16 %v301_v53, %v300_v51  ;;  %v335_v12 = vld [vmem:[#allocation3 + $0x538] sm:$0xff] }
  0x74   :  { %1916 = vmatpush3.bf16.msra.mxu1 %v797_v62  ;;  %1895 = vmatprep.subr.bf16.mxu0 %v790_v63  ;;  %v69_v59 = vld [vmem:[%s2631_s0 + $0x48] sm:$0xff]  ;;  %v319_v62 = vld [vmem:[#allocation3 + $0x4b8] sm:$0xff]  ;;  %v826_v6 = vpack.c.bf16 %v333_v55, %v332_v54  ;;  %v302_v8 = vld [vmem:[#allocation3 + $0x430] sm:$0xff] }
  0x75   :  { %1917 = vmatprep.subr.bf16.mxu1 %v806_v3  ;;  %v105_v60 = vld [vmem:[%s2631_s0 + $0x168] sm:$0xff]  ;;  %v351_v3 = vld [vmem:[#allocation3 + $0x5b8] sm:$0xff]  ;;  %v819_v7 = vpack.c.bf16 %v319_v62, %v318_v58  ;;  %v322_v25 = vld [vmem:[#allocation3 + $0x4d0] sm:$0xff] }
  0x76   :  { %v141_v63 = vpack.c.bf16 %v105_v60, %v69_v59  ;;  %v320_v13 = vld [vmem:[#allocation3 + $0x4c0] sm:$0xff]  ;;  %v321_v14 = vld [vmem:[#allocation3 + $0x4c8] sm:$0xff]  ;;  %v355_v28 = vld [vmem:[#allocation3 + $0x5d8] sm:$0xff] }
  0x77   :  { %1896 = vmatpush3.bf16.msra.mxu0 %v782_v9  ;;  %v303_v9 = vld [vmem:[#allocation3 + $0x438] sm:$0xff]  ;;  %v353_v16 = vld [vmem:[#allocation3 + $0x5c8] sm:$0xff]  ;;  %v820_v19 = vpack.c.bf16 %v321_v14, %v320_v13  ;;  %v304_v20 = vld [vmem:[#allocation3 + $0x440] sm:$0xff] }
  0x78   :  { %1918 = vmatpush3.bf16.msra.mxu1 %v798_v10  ;;  %1897 = vmatprep.subr.bf16.mxu0 %v791_v11  ;;  %v334_v10 = vld [vmem:[#allocation3 + $0x530] sm:$0xff]  ;;  %v835_v11 = vpack.c.bf16 %v351_v3, %v350_v2  ;;  %v811_v17 = vpack.c.bf16 %v303_v9, %v302_v8  ;;  %v305_v21 = vld [vmem:[#allocation3 + $0x448] sm:$0xff]  ;;  %v307_v33 = vld [vmem:[#allocation3 + $0x458] sm:$0xff] }
  0x79   :  { %1919 = vmatprep.subr.bf16.mxu1 %v807_v15  ;;  %v352_v15 = vld [vmem:[#allocation3 + $0x5c0] sm:$0xff]  ;;  %v827_v18 = vpack.c.bf16 %v335_v12, %v334_v10  ;;  %v337_v24 = vld [vmem:[#allocation3 + $0x548] sm:$0xff]  ;;  %v812_v29 = vpack.c.bf16 %v305_v21, %v304_v20  ;;  %v306_v32 = vld [vmem:[#allocation3 + $0x450] sm:$0xff] }
  0x7a   :  { %v836_v23 = vpack.c.bf16 %v353_v16, %v352_v15  ;;  %v338_v34 = vld [vmem:[#allocation3 + $0x550] sm:$0xff]  ;;  %v339_v36 = vld [vmem:[#allocation3 + $0x558] sm:$0xff]  ;;  %v324_v37 = vld [vmem:[#allocation3 + $0x4e0] sm:$0xff] }
  0x7b   :  { %1898 = vmatpush3.bf16.msra.mxu0 %v783_v22  ;;  %v336_v22 = vld [vmem:[#allocation3 + $0x540] sm:$0xff]  ;;  %v829_v42 = vpack.c.bf16 %v339_v36, %v338_v34  ;;  %v341_v48 = vld [vmem:[#allocation3 + $0x568] sm:$0xff]  ;;  %v326_v49 = vld [vmem:[#allocation3 + $0x4f0] sm:$0xff] }
  0x7c   :  { %1920 = vmatpush3.bf16.msra.mxu1 %v799_v26  ;;  %1927 = vmatprep.subr.bf16.mxu0 %v816_v27  ;;  %v323_v26 = vld [vmem:[#allocation3 + $0x4d8] sm:$0xff]  ;;  %v354_v27 = vld [vmem:[#allocation3 + $0x5d0] sm:$0xff]  ;;  %v828_v30 = vpack.c.bf16 %v337_v24, %v336_v22  ;;  %v308_v44 = vld [vmem:[#allocation3 + $0x460] sm:$0xff] }
  0x7d   :  { %1949 = vmatprep.subr.bf16.mxu1 %v832_v31  ;;  %v821_v31 = vpack.c.bf16 %v323_v26, %v322_v25  ;;  %v340_v46 = vld [vmem:[#allocation3 + $0x560] sm:$0xff]  ;;  %v327_v50 = vld [vmem:[#allocation3 + $0x4f8] sm:$0xff]  ;;  %v358_v51 = vld [vmem:[#allocation3 + $0x5f0] sm:$0xff] }
  0x7e   :  { %1154 = vmatmul.mubr.bf16.vlgmr.msra.gmra.mrb[4].mxu0 %v136_v35  ;;  %v837_v35 = vpack.c.bf16 %v355_v28, %v354_v27  ;;  %v310_v54 = vld [vmem:[#allocation3 + $0x470] sm:$0xff]  ;;  %v830_v55 = vpack.c.bf16 %v341_v48, %v340_v46  ;;  %v343_v59 = vld [vmem:[#allocation3 + $0x578] sm:$0xff]  ;;  %v376_v62 = vld [vmem:[#allocation3 + $0x680] sm:$0xff] }
  0x7f   :  { %1195 = vmatmul.mubr.bf16.vlgmr.msra.gmra.mrb[4].mxu1 %v138_v38  ;;  %1928 = vmatpush3.bf16.msra.mxu0 %v808_v39  ;;  %v325_v38 = vld [vmem:[#allocation3 + $0x4e8] sm:$0xff]  ;;  %v356_v39 = vld [vmem:[#allocation3 + $0x5e0] sm:$0xff]  ;;  %v342_v58 = vld [vmem:[#allocation3 + $0x570] sm:$0xff] }
  0x80   :  { %1950 = vmatpush3.bf16.msra.mxu1 %v824_v40  ;;  %1929 = vmatprep.subr.bf16.mxu0 %v817_v41  ;;  %v357_v40 = vld [vmem:[#allocation3 + $0x5e8] sm:$0xff]  ;;  %v813_v41 = vpack.c.bf16 %v307_v33, %v306_v32  ;;  %v822_v43 = vpack.c.bf16 %v325_v38, %v324_v37  ;;  %v104_v0 = vld [vmem:[%s2631_s0 + $0x160] sm:$0xff]  ;;  %v378_v13 = vld [vmem:[#allocation3 + $0x690] sm:$0xff] }
  0x81   :  { %1951 = vmatprep.subr.bf16.mxu1 %v833_v45  ;;  %1235 = vmatprep.mubr.bf16.mxu0 %v141_v63  ;;  %v309_v45 = vld [vmem:[#allocation3 + $0x468] sm:$0xff]  ;;  %v838_v47 = vpack.c.bf16 %v357_v40, %v356_v39  ;;  %v408_v1 = vld [vmem:[#allocation3 + $0x780] sm:$0xff]  ;;  %v379_v14 = vld [vmem:[#allocation3 + $0x698] sm:$0xff] }
  0x82   :  { %1276 = vmatprep.mubr.bf16.mxu1 %v143_v4  ;;  %v814_v53 = vpack.c.bf16 %v309_v45, %v308_v44  ;;  %v377_v63 = vld [vmem:[#allocation3 + $0x688] sm:$0xff]  ;;  %v392_v10 = vld [vmem:[#allocation3 + $0x700] sm:$0xff]  ;;  %v410_v15 = vld [vmem:[#allocation3 + $0x790] sm:$0xff]  ;;  %v849_v25 = vpack.c.bf16 %v379_v14, %v378_v13 }
  0x83   :  { %1930 = vmatpush3.bf16.msra.mxu0 %v809_v52  ;;  %v359_v52 = vld [vmem:[#allocation3 + $0x5f8] sm:$0xff]  ;;  %v409_v2 = vld [vmem:[#allocation3 + $0x788] sm:$0xff]  ;;  %v848_v8 = vpack.c.bf16 %v377_v63, %v376_v62  ;;  %v362_v26 = vld [vmem:[#allocation3 + $0x610] sm:$0xff] }
  0x84   :  { %1952 = vmatpush3.bf16.msra.mxu1 %v825_v56  ;;  %1931 = vmatprep.subr.bf16.mxu0 %v818_v57  ;;  %v823_v56 = vpack.c.bf16 %v327_v50, %v326_v49  ;;  %v311_v57 = vld [vmem:[#allocation3 + $0x478] sm:$0xff]  ;;  %v839_v60 = vpack.c.bf16 %v359_v52, %v358_v51  ;;  %v70_v4 = vld [vmem:[%s2631_s0 + $0x50] sm:$0xff]  ;;  %v864_v12 = vpack.c.bf16 %v409_v2, %v408_v1  ;;  %v412_v34 = vld [vmem:[#allocation3 + $0x7a0] sm:$0xff] }
  0x85   :  { %1953 = vmatprep.subr.bf16.mxu1 %v834_v61  ;;  %v68_v61 = vld [vmem:[%s2631_s0 + $0x40] sm:$0xff]  ;;  %v815_v3 = vpack.c.bf16 %v311_v57, %v310_v54  ;;  %v361_v9 = vld [vmem:[#allocation3 + $0x608] sm:$0xff]  ;;  %v75_v22 = vld [vmem:[%s2631_s0 + $0x78] sm:$0xff] }
  0x86   :  { %v140_v16 = vpack.c.bf16 %v104_v0, %v68_v61  ;;  %v363_v27 = vld [vmem:[#allocation3 + $0x618] sm:$0xff]  ;;  %v394_v28 = vld [vmem:[#allocation3 + $0x710] sm:$0xff]  ;;  %v381_v32 = vld [vmem:[#allocation3 + $0x6a8] sm:$0xff] }
  0x87   :  { %1932 = vmatpush3.bf16.msra.mxu0 %v810_v5  ;;  %v106_v5 = vld [vmem:[%s2631_s0 + $0x170] sm:$0xff]  ;;  %v841_v37 = vpack.c.bf16 %v363_v27, %v362_v26  ;;  %v364_v40 = vld [vmem:[#allocation3 + $0x620] sm:$0xff]  ;;  %v383_v46 = vld [vmem:[#allocation3 + $0x6b8] sm:$0xff] }
  0x88   :  { %1954 = vmatpush3.bf16.msra.mxu1 %v826_v6  ;;  %1933 = vmatprep.subr.bf16.mxu0 %v819_v7  ;;  %v360_v6 = vld [vmem:[#allocation3 + $0x600] sm:$0xff]  ;;  %v831_v7 = vpack.c.bf16 %v343_v59, %v342_v58  ;;  %v142_v20 = vpack.c.bf16 %v106_v5, %v70_v4  ;;  %v397_v44 = vld [vmem:[#allocation3 + $0x728] sm:$0xff]  ;;  %v382_v45 = vld [vmem:[#allocation3 + $0x6b0] sm:$0xff] }
  0x89   :  { %1955 = vmatprep.subr.bf16.mxu1 %v835_v11  ;;  %v393_v11 = vld [vmem:[#allocation3 + $0x708] sm:$0xff]  ;;  %v840_v21 = vpack.c.bf16 %v361_v9, %v360_v6  ;;  %v415_v48 = vld [vmem:[#allocation3 + $0x7b8] sm:$0xff]  ;;  %v851_v51 = vpack.c.bf16 %v383_v46, %v382_v45  ;;  %v366_v52 = vld [vmem:[#allocation3 + $0x630] sm:$0xff] }
  0x8a   :  { %v856_v24 = vpack.c.bf16 %v393_v11, %v392_v10  ;;  %v398_v54 = vld [vmem:[#allocation3 + $0x730] sm:$0xff]  ;;  %v384_v57 = vld [vmem:[#allocation3 + $0x6c0] sm:$0xff]  ;;  %v385_v58 = vld [vmem:[#allocation3 + $0x6c8] sm:$0xff] }
  0x8b   :  { %1934 = vmatpush3.bf16.msra.mxu0 %v811_v17  ;;  %v411_v17 = vld [vmem:[#allocation3 + $0x798] sm:$0xff]  ;;  %v416_v59 = vld [vmem:[#allocation3 + $0x7c0] sm:$0xff]  ;;  %v852_v63 = vpack.c.bf16 %v385_v58, %v384_v57  ;;  %v369_v1 = vld [vmem:[#allocation3 + $0x648] sm:$0xff] }
  0x8c   :  { %1956 = vmatpush3.bf16.msra.mxu1 %v827_v18  ;;  %1935 = vmatprep.subr.bf16.mxu0 %v820_v19  ;;  %v73_v18 = vld [vmem:[%s2631_s0 + $0x68] sm:$0xff]  ;;  %v386_v5 = vld [vmem:[#allocation3 + $0x6d0] sm:$0xff]  ;;  %v387_v6 = vld [vmem:[#allocation3 + $0x6d8] sm:$0xff] }
  0x8d   :  { %1957 = vmatprep.subr.bf16.mxu1 %v836_v23  ;;  %v109_v19 = vld [vmem:[%s2631_s0 + $0x188] sm:$0xff]  ;;  %v111_v23 = vld [vmem:[%s2631_s0 + $0x198] sm:$0xff]  ;;  %v853_v11 = vpack.c.bf16 %v387_v6, %v386_v5 }
  0x8e   :  { %v145_v33 = vpack.c.bf16 %v109_v19, %v73_v18  ;;  %v147_v36 = vpack.c.bf16 %v111_v23, %v75_v22  ;;  %v368_v0 = vld [vmem:[#allocation3 + $0x640] sm:$0xff]  ;;  %v401_v4 = vld [vmem:[#allocation3 + $0x748] sm:$0xff]  ;;  %v371_v13 = vld [vmem:[#allocation3 + $0x658] sm:$0xff] }
  0x8f   :  { %1936 = vmatpush3.bf16.msra.mxu0 %v812_v29  ;;  %v865_v29 = vpack.c.bf16 %v411_v17, %v410_v15  ;;  %v400_v2 = vld [vmem:[#allocation3 + $0x740] sm:$0xff]  ;;  %v844_v9 = vpack.c.bf16 %v369_v1, %v368_v0  ;;  %v402_v14 = vld [vmem:[#allocation3 + $0x750] sm:$0xff]  ;;  %v389_v18 = vld [vmem:[#allocation3 + $0x6e8] sm:$0xff] }
  0x90   :  { %1958 = vmatpush3.bf16.msra.mxu1 %v828_v30  ;;  %1937 = vmatprep.subr.bf16.mxu0 %v821_v31  ;;  %v395_v30 = vld [vmem:[#allocation3 + $0x718] sm:$0xff]  ;;  %v380_v31 = vld [vmem:[#allocation3 + $0x6a0] sm:$0xff]  ;;  %v860_v10 = vpack.c.bf16 %v401_v4, %v400_v2  ;;  %v473_v46 = vld [vmem:[#allocation3 + $0x988] sm:$0xff] }
  0x91   :  { %1959 = vmatprep.subr.bf16.mxu1 %v837_v35  ;;  %v413_v35 = vld [vmem:[#allocation3 + $0x7a8] sm:$0xff]  ;;  %v857_v38 = vpack.c.bf16 %v395_v30, %v394_v28  ;;  %v850_v39 = vpack.c.bf16 %v381_v32, %v380_v31  ;;  %v388_v17 = vld [vmem:[#allocation3 + $0x6e0] sm:$0xff]  ;;  %v391_v30 = vld [vmem:[#allocation3 + $0x6f8] sm:$0xff] }
  0x92   :  { %v420_v19 = vld [vmem:[#allocation3 + $0x7e0] sm:$0xff]  ;;  %v854_v23 = vpack.c.bf16 %v389_v18, %v388_v17  ;;  %v405_v28 = vld [vmem:[#allocation3 + $0x768] sm:$0xff]  ;;  %v422_v31 = vld [vmem:[#allocation3 + $0x7f0] sm:$0xff] }
  0x93   :  { %1938 = vmatpush3.bf16.msra.mxu0 %v813_v41  ;;  %v365_v41 = vld [vmem:[#allocation3 + $0x628] sm:$0xff]  ;;  %v404_v26 = vld [vmem:[#allocation3 + $0x760] sm:$0xff]  ;;  %v423_v32 = vld [vmem:[#allocation3 + $0x7f8] sm:$0xff] }
  0x94   :  { %1960 = vmatpush3.bf16.msra.mxu1 %v829_v42  ;;  %1939 = vmatprep.subr.bf16.mxu0 %v822_v43  ;;  %v396_v42 = vld [vmem:[#allocation3 + $0x720] sm:$0xff]  ;;  %v866_v43 = vpack.c.bf16 %v413_v35, %v412_v34  ;;  %v842_v49 = vpack.c.bf16 %v365_v41, %v364_v40  ;;  %v374_v34 = vld [vmem:[#allocation3 + $0x670] sm:$0xff]  ;;  %v862_v35 = vpack.c.bf16 %v405_v28, %v404_v26  ;;  %v443_v58 = vld [vmem:[#allocation3 + $0x898] sm:$0xff] }
  0x95   :  { %1961 = vmatprep.subr.bf16.mxu1 %v838_v47  ;;  %v414_v47 = vld [vmem:[#allocation3 + $0x7b0] sm:$0xff]  ;;  %v858_v50 = vpack.c.bf16 %v397_v44, %v396_v42  ;;  %v871_v40 = vpack.c.bf16 %v423_v32, %v422_v31  ;;  %v72_v41 = vld [vmem:[%s2631_s0 + $0x60] sm:$0xff] }
  0x96   :  { %v440_v42 = vld [vmem:[#allocation3 + $0x880] sm:$0xff]  ;;  %v442_v57 = vld [vmem:[#allocation3 + $0x890] sm:$0xff]  ;;  %v447_v26 = vld [vmem:[#allocation3 + $0x8b8] sm:$0xff] }
  0x97   :  { %1940 = vmatpush3.bf16.msra.mxu0 %v814_v53  ;;  %v367_v53 = vld [vmem:[#allocation3 + $0x638] sm:$0xff]  ;;  %v472_v45 = vld [vmem:[#allocation3 + $0x980] sm:$0xff]  ;;  %v881_v5 = vpack.c.bf16 %v443_v58, %v442_v57  ;;  %v426_v6 = vld [vmem:[#allocation3 + $0x810] sm:$0xff] }
  0x98   :  { %1962 = vmatpush3.bf16.msra.mxu1 %v830_v55  ;;  %1941 = vmatprep.subr.bf16.mxu0 %v823_v56  ;;  %v867_v55 = vpack.c.bf16 %v415_v48, %v414_v47  ;;  %v399_v56 = vld [vmem:[#allocation3 + $0x738] sm:$0xff]  ;;  %v843_v61 = vpack.c.bf16 %v367_v53, %v366_v52  ;;  %v74_v48 = vld [vmem:[%s2631_s0 + $0x70] sm:$0xff] }
  0x99   :  { %1963 = vmatprep.subr.bf16.mxu1 %v839_v60  ;;  %v417_v60 = vld [vmem:[#allocation3 + $0x7c8] sm:$0xff]  ;;  %v859_v62 = vpack.c.bf16 %v399_v56, %v398_v54  ;;  %v108_v44 = vld [vmem:[%s2631_s0 + $0x180] sm:$0xff]  ;;  %v896_v56 = vpack.c.bf16 %v473_v46, %v472_v45  ;;  %v79_v2 = vld [vmem:[%s2631_s0 + $0x98] sm:$0xff] }
  0x9a   :  { %v425_v53 = vld [vmem:[#allocation3 + $0x808] sm:$0xff]  ;;  %v456_v54 = vld [vmem:[#allocation3 + $0x900] sm:$0xff]  ;;  %v479_v28 = vld [vmem:[#allocation3 + $0x9b8] sm:$0xff] }
  0x9b   :  { %1942 = vmatpush3.bf16.msra.mxu0 %v815_v3  ;;  %v868_v3 = vpack.c.bf16 %v417_v60, %v416_v59  ;;  %v474_v59 = vld [vmem:[#allocation3 + $0x990] sm:$0xff]  ;;  %v144_v60 = vpack.c.bf16 %v108_v44, %v72_v41  ;;  %v432_v44 = vld [vmem:[#allocation3 + $0x840] sm:$0xff]  ;;  %v433_v45 = vld [vmem:[#allocation3 + $0x848] sm:$0xff] }
  0x9c   :  { %1964 = vmatpush3.bf16.msra.mxu1 %v831_v7  ;;  %1971 = vmatprep.subr.bf16.mxu0 %v848_v8  ;;  %v418_v7 = vld [vmem:[#allocation3 + $0x7d0] sm:$0xff]  ;;  %v419_v8 = vld [vmem:[#allocation3 + $0x7d8] sm:$0xff]  ;;  %v464_v46 = vld [vmem:[#allocation3 + $0x940] sm:$0xff] }
  0x9d   :  { %1993 = vmatprep.subr.bf16.mxu1 %v864_v12  ;;  %v370_v12 = vld [vmem:[#allocation3 + $0x650] sm:$0xff]  ;;  %v869_v15 = vpack.c.bf16 %v419_v8, %v418_v7  ;;  %v427_v7 = vld [vmem:[#allocation3 + $0x818] sm:$0xff] }
  0x9e   :  { %1236 = vmatmul.mubr.bf16.vlgmr.msra.gmra.mrb[8].mxu0 %v140_v16  ;;  %v403_v16 = vld [vmem:[#allocation3 + $0x758] sm:$0xff]  ;;  %v458_v8 = vld [vmem:[#allocation3 + $0x910] sm:$0xff]  ;;  %v873_v17 = vpack.c.bf16 %v427_v7, %v426_v6  ;;  %v468_v6 = vld [vmem:[#allocation3 + $0x960] sm:$0xff] }
  0x9f   :  { %1277 = vmatmul.mubr.bf16.vlgmr.msra.gmra.mrb[8].mxu1 %v142_v20  ;;  %1972 = vmatpush3.bf16.msra.mxu0 %v840_v21  ;;  %v421_v20 = vld [vmem:[#allocation3 + $0x7e8] sm:$0xff]  ;;  %v845_v21 = vpack.c.bf16 %v371_v13, %v370_v12  ;;  %v861_v22 = vpack.c.bf16 %v403_v16, %v402_v14  ;;  %v476_v14 = vld [vmem:[#allocation3 + $0x9a0] sm:$0xff]  ;;  %v430_v32 = vld [vmem:[#allocation3 + $0x830] sm:$0xff] }
  0xa0   :  { %1994 = vmatpush3.bf16.msra.mxu1 %v856_v24  ;;  %1973 = vmatprep.subr.bf16.mxu0 %v849_v25  ;;  %v372_v24 = vld [vmem:[#allocation3 + $0x660] sm:$0xff]  ;;  %v373_v25 = vld [vmem:[#allocation3 + $0x668] sm:$0xff]  ;;  %v870_v27 = vpack.c.bf16 %v421_v20, %v420_v19  ;;  %v435_v57 = vld [vmem:[#allocation3 + $0x858] sm:$0xff] }
  0xa1   :  { %1995 = vmatprep.subr.bf16.mxu1 %v865_v29  ;;  %1317 = vmatprep.mubr.bf16.mxu0 %v145_v33  ;;  %v390_v29 = vld [vmem:[#allocation3 + $0x6f0] sm:$0xff]  ;;  %v846_v33 = vpack.c.bf16 %v373_v25, %v372_v24  ;;  %v445_v12 = vld [vmem:[#allocation3 + $0x8a8] sm:$0xff]  ;;  %v428_v20 = vld [vmem:[#allocation3 + $0x820] sm:$0xff] }
  0xa2   :  { %1358 = vmatprep.mubr.bf16.mxu1 %v147_v36  ;;  %v855_v36 = vpack.c.bf16 %v391_v30, %v390_v29  ;;  %v461_v24 = vld [vmem:[#allocation3 + $0x928] sm:$0xff]  ;;  %v446_v25 = vld [vmem:[#allocation3 + $0x8b0] sm:$0xff] }
  0xa3   :  { %1974 = vmatpush3.bf16.msra.mxu0 %v841_v37  ;;  %v375_v37 = vld [vmem:[#allocation3 + $0x678] sm:$0xff]  ;;  %v883_v31 = vpack.c.bf16 %v447_v26, %v446_v25  ;;  %v466_v58 = vld [vmem:[#allocation3 + $0x950] sm:$0xff]  ;;  %v536_v25 = vld [vmem:[#allocation3 + $0xb80] sm:$0xff] }
  0xa4   :  { %1996 = vmatpush3.bf16.msra.mxu1 %v857_v38  ;;  %1975 = vmatprep.subr.bf16.mxu0 %v850_v39  ;;  %v406_v38 = vld [vmem:[#allocation3 + $0x770] sm:$0xff]  ;;  %v407_v39 = vld [vmem:[#allocation3 + $0x778] sm:$0xff]  ;;  %v847_v47 = vpack.c.bf16 %v375_v37, %v374_v34  ;;  %v448_v37 = vld [vmem:[#allocation3 + $0x8c0] sm:$0xff] }
  0xa5   :  { %1997 = vmatprep.subr.bf16.mxu1 %v866_v43  ;;  %v441_v43 = vld [vmem:[#allocation3 + $0x888] sm:$0xff]  ;;  %v462_v34 = vld [vmem:[#allocation3 + $0x930] sm:$0xff] }
  0xa6   :  { %v880_v52 = vpack.c.bf16 %v441_v43, %v440_v42  ;;  %v537_v26 = vld [vmem:[#allocation3 + $0xb88] sm:$0xff] }
  0xa7   :  { %1976 = vmatpush3.bf16.msra.mxu0 %v842_v49  ;;  %v110_v49 = vld [vmem:[%s2631_s0 + $0x190] sm:$0xff] }
  0xa8   :  { %1998 = vmatpush3.bf16.msra.mxu1 %v858_v50  ;;  %1977 = vmatprep.subr.bf16.mxu0 %v851_v51  ;;  %v424_v50 = vld [vmem:[#allocation3 + $0x800] sm:$0xff]  ;;  %v863_v51 = vpack.c.bf16 %v407_v39, %v406_v38  ;;  %v146_v0 = vpack.c.bf16 %v110_v49, %v74_v48  ;;  %v449_v38 = vld [vmem:[#allocation3 + $0x8c8] sm:$0xff]  ;;  %v450_v49 = vld [vmem:[#allocation3 + $0x8d0] sm:$0xff] }
  0xa9   :  { %1999 = vmatprep.subr.bf16.mxu1 %v867_v55  ;;  %v457_v55 = vld [vmem:[#allocation3 + $0x908] sm:$0xff]  ;;  %v872_v1 = vpack.c.bf16 %v425_v53, %v424_v50  ;;  %v480_v39 = vld [vmem:[#allocation3 + $0x9c0] sm:$0xff]  ;;  %v884_v43 = vpack.c.bf16 %v449_v38, %v448_v37  ;;  %v451_v50 = vld [vmem:[#allocation3 + $0x8d8] sm:$0xff]  ;;  %v876_v53 = vpack.c.bf16 %v433_v45, %v432_v44 }
  0xaa   :  { %v888_v4 = vpack.c.bf16 %v457_v55, %v456_v54  ;;  %v465_v48 = vld [vmem:[#allocation3 + $0x948] sm:$0xff]  ;;  %v885_v55 = vpack.c.bf16 %v451_v50, %v450_v49  ;;  %v506_v37 = vld [vmem:[#allocation3 + $0xa90] sm:$0xff]  ;;  %v507_v38 = vld [vmem:[#allocation3 + $0xa98] sm:$0xff] }
  0xab   :  { %1978 = vmatpush3.bf16.msra.mxu0 %v843_v61  ;;  %v475_v61 = vld [vmem:[#allocation3 + $0x998] sm:$0xff]  ;;  %v892_v54 = vpack.c.bf16 %v465_v48, %v464_v46  ;;  %v913_v49 = vpack.c.bf16 %v507_v38, %v506_v37  ;;  %v490_v50 = vld [vmem:[#allocation3 + $0xa10] sm:$0xff] }
  0xac   :  { %2000 = vmatpush3.bf16.msra.mxu1 %v859_v62  ;;  %1979 = vmatprep.subr.bf16.mxu0 %v852_v63  ;;  %v77_v62 = vld [vmem:[%s2631_s0 + $0x88] sm:$0xff]  ;;  %v83_v46 = vld [vmem:[%s2631_s0 + $0xb8] sm:$0xff] }
  0xad   :  { %2001 = vmatprep.subr.bf16.mxu1 %v868_v3  ;;  %v113_v63 = vld [vmem:[%s2631_s0 + $0x1a8] sm:$0xff]  ;;  %v115_v3 = vld [vmem:[%s2631_s0 + $0x1b8] sm:$0xff] }
  0xae   :  { %v149_v13 = vpack.c.bf16 %v113_v63, %v77_v62  ;;  %v151_v16 = vpack.c.bf16 %v115_v3, %v79_v2  ;;  %v453_v62 = vld [vmem:[#allocation3 + $0x8e8] sm:$0xff]  ;;  %v484_v63 = vld [vmem:[#allocation3 + $0x9e0] sm:$0xff]  ;;  %v499_v37 = vld [vmem:[#allocation3 + $0xa58] sm:$0xff] }
  0xaf   :  { %1980 = vmatpush3.bf16.msra.mxu0 %v844_v9  ;;  %v897_v9 = vpack.c.bf16 %v475_v61, %v474_v59  ;;  %v452_v61 = vld [vmem:[#allocation3 + $0x8e0] sm:$0xff]  ;;  %v530_v38 = vld [vmem:[#allocation3 + $0xb50] sm:$0xff] }
  0xb0   :  { %2002 = vmatpush3.bf16.msra.mxu1 %v860_v10  ;;  %1981 = vmatprep.subr.bf16.mxu0 %v853_v11  ;;  %v459_v10 = vld [vmem:[#allocation3 + $0x918] sm:$0xff]  ;;  %v444_v11 = vld [vmem:[#allocation3 + $0x8a0] sm:$0xff]  ;;  %v886_v3 = vpack.c.bf16 %v453_v62, %v452_v61 }
  0xb1   :  { %2003 = vmatprep.subr.bf16.mxu1 %v869_v15  ;;  %v477_v15 = vld [vmem:[#allocation3 + $0x9a8] sm:$0xff]  ;;  %v889_v18 = vpack.c.bf16 %v459_v10, %v458_v8  ;;  %v882_v19 = vpack.c.bf16 %v445_v12, %v444_v11  ;;  %v455_v10 = vld [vmem:[#allocation3 + $0x8f8] sm:$0xff]  ;;  %v486_v11 = vld [vmem:[#allocation3 + $0x9f0] sm:$0xff] }
  0xb2   :  { %v469_v8 = vld [vmem:[#allocation3 + $0x968] sm:$0xff]  ;;  %v487_v12 = vld [vmem:[#allocation3 + $0x9f8] sm:$0xff] }
  0xb3   :  { %1982 = vmatpush3.bf16.msra.mxu0 %v845_v21  ;;  %v429_v21 = vld [vmem:[#allocation3 + $0x828] sm:$0xff] }
  0xb4   :  { %2004 = vmatpush3.bf16.msra.mxu1 %v861_v22  ;;  %1983 = vmatprep.subr.bf16.mxu0 %v854_v23  ;;  %v460_v22 = vld [vmem:[#allocation3 + $0x920] sm:$0xff]  ;;  %v898_v23 = vpack.c.bf16 %v477_v15, %v476_v14  ;;  %v874_v29 = vpack.c.bf16 %v429_v21, %v428_v20  ;;  %v438_v14 = vld [vmem:[#allocation3 + $0x870] sm:$0xff]  ;;  %v894_v15 = vpack.c.bf16 %v469_v8, %v468_v6  ;;  %v511_v6 = vld [vmem:[#allocation3 + $0xab8] sm:$0xff] }
  0xb5   :  { %2005 = vmatprep.subr.bf16.mxu1 %v870_v27  ;;  %v478_v27 = vld [vmem:[#allocation3 + $0x9b0] sm:$0xff]  ;;  %v890_v30 = vpack.c.bf16 %v461_v24, %v460_v22  ;;  %v903_v20 = vpack.c.bf16 %v487_v12, %v486_v11  ;;  %v76_v21 = vld [vmem:[%s2631_s0 + $0x80] sm:$0xff] }
  0xb6   :  { %v504_v22 = vld [vmem:[#allocation3 + $0xa80] sm:$0xff]  ;;  %v543_v8 = vld [vmem:[#allocation3 + $0xbb8] sm:$0xff]  ;;  %v494_v12 = vld [vmem:[#allocation3 + $0xa30] sm:$0xff] }
  0xb7   :  { %1984 = vmatpush3.bf16.msra.mxu0 %v846_v33  ;;  %v431_v33 = vld [vmem:[#allocation3 + $0x838] sm:$0xff] }
  0xb8   :  { %2006 = vmatpush3.bf16.msra.mxu1 %v862_v35  ;;  %1985 = vmatprep.subr.bf16.mxu0 %v855_v36  ;;  %v899_v35 = vpack.c.bf16 %v479_v28, %v478_v27  ;;  %v463_v36 = vld [vmem:[#allocation3 + $0x938] sm:$0xff]  ;;  %v875_v41 = vpack.c.bf16 %v431_v33, %v430_v32  ;;  %v78_v28 = vld [vmem:[%s2631_s0 + $0x90] sm:$0xff] }
  0xb9   :  { %2007 = vmatprep.subr.bf16.mxu1 %v871_v40  ;;  %v481_v40 = vld [vmem:[#allocation3 + $0x9c8] sm:$0xff]  ;;  %v891_v42 = vpack.c.bf16 %v463_v36, %v462_v34  ;;  %v112_v24 = vld [vmem:[%s2631_s0 + $0x1a0] sm:$0xff]  ;;  %v928_v36 = vpack.c.bf16 %v537_v26, %v536_v25 }
  0xba   :  { %v489_v33 = vld [vmem:[#allocation3 + $0xa08] sm:$0xff]  ;;  %v520_v34 = vld [vmem:[#allocation3 + $0xb00] sm:$0xff] }
  0xbb   :  { %1986 = vmatpush3.bf16.msra.mxu0 %v847_v47  ;;  %v900_v47 = vpack.c.bf16 %v481_v40, %v480_v39  ;;  %v538_v39 = vld [vmem:[#allocation3 + $0xb90] sm:$0xff]  ;;  %v148_v40 = vpack.c.bf16 %v112_v24, %v76_v21  ;;  %v496_v24 = vld [vmem:[#allocation3 + $0xa40] sm:$0xff]  ;;  %v497_v25 = vld [vmem:[#allocation3 + $0xa48] sm:$0xff] }
  0xbc   :  { %2008 = vmatpush3.bf16.msra.mxu1 %v863_v51  ;;  %2015 = vmatprep.subr.bf16.mxu0 %v880_v52  ;;  %v482_v51 = vld [vmem:[#allocation3 + $0x9d0] sm:$0xff]  ;;  %v483_v52 = vld [vmem:[#allocation3 + $0x9d8] sm:$0xff]  ;;  %v528_v26 = vld [vmem:[#allocation3 + $0xb40] sm:$0xff] }
  0xbd   :  { %2037 = vmatprep.subr.bf16.mxu1 %v896_v56  ;;  %v434_v56 = vld [vmem:[#allocation3 + $0x850] sm:$0xff]  ;;  %v901_v59 = vpack.c.bf16 %v483_v52, %v482_v51  ;;  %v491_v51 = vld [vmem:[#allocation3 + $0xa18] sm:$0xff] }
  0xbe   :  { %1318 = vmatmul.mubr.bf16.vlgmr.msra.gmra.mrb[12].mxu0 %v144_v60  ;;  %v467_v60 = vld [vmem:[#allocation3 + $0x958] sm:$0xff]  ;;  %v522_v52 = vld [vmem:[#allocation3 + $0xb10] sm:$0xff]  ;;  %v905_v61 = vpack.c.bf16 %v491_v51, %v490_v50  ;;  %v532_v50 = vld [vmem:[#allocation3 + $0xb60] sm:$0xff] }
  0xbf   :  { %1359 = vmatmul.mubr.bf16.vlgmr.msra.gmra.mrb[12].mxu1 %v146_v0  ;;  %2016 = vmatpush3.bf16.msra.mxu0 %v872_v1  ;;  %v485_v0 = vld [vmem:[#allocation3 + $0x9e8] sm:$0xff]  ;;  %v877_v1 = vpack.c.bf16 %v435_v57, %v434_v56  ;;  %v893_v2 = vpack.c.bf16 %v467_v60, %v466_v58  ;;  %v540_v58 = vld [vmem:[#allocation3 + $0xba0] sm:$0xff] }
  0xc0   :  { %2038 = vmatpush3.bf16.msra.mxu1 %v888_v4  ;;  %2017 = vmatprep.subr.bf16.mxu0 %v881_v5  ;;  %v436_v4 = vld [vmem:[#allocation3 + $0x860] sm:$0xff]  ;;  %v437_v5 = vld [vmem:[#allocation3 + $0x868] sm:$0xff]  ;;  %v902_v7 = vpack.c.bf16 %v485_v0, %v484_v63 }
  0xc1   :  { %2039 = vmatprep.subr.bf16.mxu1 %v897_v9  ;;  %1399 = vmatprep.mubr.bf16.mxu0 %v149_v13  ;;  %v454_v9 = vld [vmem:[#allocation3 + $0x8f0] sm:$0xff]  ;;  %v878_v13 = vpack.c.bf16 %v437_v5, %v436_v4  ;;  %v509_v56 = vld [vmem:[#allocation3 + $0xaa8] sm:$0xff]  ;;  %v492_v0 = vld [vmem:[#allocation3 + $0xa20] sm:$0xff] }
  0xc2   :  { %1440 = vmatprep.mubr.bf16.mxu1 %v151_v16  ;;  %v887_v16 = vpack.c.bf16 %v455_v10, %v454_v9  ;;  %v525_v4 = vld [vmem:[#allocation3 + $0xb28] sm:$0xff]  ;;  %v510_v5 = vld [vmem:[#allocation3 + $0xab0] sm:$0xff] }
  0xc3   :  { %2018 = vmatpush3.bf16.msra.mxu0 %v873_v17  ;;  %v439_v17 = vld [vmem:[#allocation3 + $0x878] sm:$0xff]  ;;  %v915_v11 = vpack.c.bf16 %v511_v6, %v510_v5  ;;  %v600_v5 = vld [vmem:[#allocation3 + $0xd80] sm:$0xff]  ;;  %v601_v6 = vld [vmem:[#allocation3 + $0xd88] sm:$0xff] }
  0xc4   :  { %2040 = vmatpush3.bf16.msra.mxu1 %v889_v18  ;;  %2019 = vmatprep.subr.bf16.mxu0 %v882_v19  ;;  %v470_v18 = vld [vmem:[#allocation3 + $0x970] sm:$0xff]  ;;  %v471_v19 = vld [vmem:[#allocation3 + $0x978] sm:$0xff]  ;;  %v879_v27 = vpack.c.bf16 %v439_v17, %v438_v14  ;;  %v512_v17 = vld [vmem:[#allocation3 + $0xac0] sm:$0xff] }
  0xc5   :  { %2041 = vmatprep.subr.bf16.mxu1 %v898_v23  ;;  %v505_v23 = vld [vmem:[#allocation3 + $0xa88] sm:$0xff]  ;;  %v526_v14 = vld [vmem:[#allocation3 + $0xb30] sm:$0xff] }
  0xc6   :  { %v912_v32 = vpack.c.bf16 %v505_v23, %v504_v22 }
  0xc7   :  { %2020 = vmatpush3.bf16.msra.mxu0 %v874_v29  ;;  %v114_v29 = vld [vmem:[%s2631_s0 + $0x1b0] sm:$0xff] }
  0xc8   :  { %2042 = vmatpush3.bf16.msra.mxu1 %v890_v30  ;;  %2021 = vmatprep.subr.bf16.mxu0 %v883_v31  ;;  %v488_v30 = vld [vmem:[#allocation3 + $0xa00] sm:$0xff]  ;;  %v895_v31 = vpack.c.bf16 %v471_v19, %v470_v18  ;;  %v150_v44 = vpack.c.bf16 %v114_v29, %v78_v28  ;;  %v513_v18 = vld [vmem:[#allocation3 + $0xac8] sm:$0xff]  ;;  %v514_v29 = vld [vmem:[#allocation3 + $0xad0] sm:$0xff] }
  0xc9   :  { %2043 = vmatprep.subr.bf16.mxu1 %v899_v35  ;;  %v521_v35 = vld [vmem:[#allocation3 + $0xb08] sm:$0xff]  ;;  %v904_v45 = vpack.c.bf16 %v489_v33, %v488_v30  ;;  %v544_v19 = vld [vmem:[#allocation3 + $0xbc0] sm:$0xff]  ;;  %v916_v23 = vpack.c.bf16 %v513_v18, %v512_v17  ;;  %v515_v30 = vld [vmem:[#allocation3 + $0xad8] sm:$0xff]  ;;  %v908_v33 = vpack.c.bf16 %v497_v25, %v496_v24 }
  0xca   :  { %v920_v48 = vpack.c.bf16 %v521_v35, %v520_v34  ;;  %v529_v28 = vld [vmem:[#allocation3 + $0xb48] sm:$0xff]  ;;  %v917_v35 = vpack.c.bf16 %v515_v30, %v514_v29  ;;  %v570_v17 = vld [vmem:[#allocation3 + $0xc90] sm:$0xff]  ;;  %v571_v18 = vld [vmem:[#allocation3 + $0xc98] sm:$0xff] }
  0xcb   :  { %2022 = vmatpush3.bf16.msra.mxu0 %v875_v41  ;;  %v539_v41 = vld [vmem:[#allocation3 + $0xb98] sm:$0xff]  ;;  %v924_v34 = vpack.c.bf16 %v529_v28, %v528_v26  ;;  %v945_v29 = vpack.c.bf16 %v571_v18, %v570_v17  ;;  %v554_v30 = vld [vmem:[#allocation3 + $0xc10] sm:$0xff] }
  0xcc   :  { %2044 = vmatpush3.bf16.msra.mxu1 %v891_v42  ;;  %2023 = vmatprep.subr.bf16.mxu0 %v884_v43  ;;  %v81_v42 = vld [vmem:[%s2631_s0 + $0xa8] sm:$0xff]  ;;  %v87_v26 = vld [vmem:[%s2631_s0 + $0xd8] sm:$0xff] }
  0xcd   :  { %2045 = vmatprep.subr.bf16.mxu1 %v900_v47  ;;  %v117_v43 = vld [vmem:[%s2631_s0 + $0x1c8] sm:$0xff]  ;;  %v119_v47 = vld [vmem:[%s2631_s0 + $0x1d8] sm:$0xff] }
  0xce   :  { %v153_v57 = vpack.c.bf16 %v117_v43, %v81_v42  ;;  %v155_v60 = vpack.c.bf16 %v119_v47, %v83_v46  ;;  %v517_v42 = vld [vmem:[#allocation3 + $0xae8] sm:$0xff]  ;;  %v548_v43 = vld [vmem:[#allocation3 + $0xbe0] sm:$0xff]  ;;  %v563_v17 = vld [vmem:[#allocation3 + $0xc58] sm:$0xff] }
  0xcf   :  { %2024 = vmatpush3.bf16.msra.mxu0 %v876_v53  ;;  %v929_v53 = vpack.c.bf16 %v539_v41, %v538_v39  ;;  %v516_v41 = vld [vmem:[#allocation3 + $0xae0] sm:$0xff]  ;;  %v594_v18 = vld [vmem:[#allocation3 + $0xd50] sm:$0xff] }
  0xd0   :  { %2046 = vmatpush3.bf16.msra.mxu1 %v892_v54  ;;  %2025 = vmatprep.subr.bf16.mxu0 %v885_v55  ;;  %v523_v54 = vld [vmem:[#allocation3 + $0xb18] sm:$0xff]  ;;  %v508_v55 = vld [vmem:[#allocation3 + $0xaa0] sm:$0xff]  ;;  %v918_v47 = vpack.c.bf16 %v517_v42, %v516_v41 }
  0xd1   :  { %2047 = vmatprep.subr.bf16.mxu1 %v901_v59  ;;  %v541_v59 = vld [vmem:[#allocation3 + $0xba8] sm:$0xff]  ;;  %v921_v62 = vpack.c.bf16 %v523_v54, %v522_v52  ;;  %v914_v63 = vpack.c.bf16 %v509_v56, %v508_v55  ;;  %v519_v54 = vld [vmem:[#allocation3 + $0xaf8] sm:$0xff]  ;;  %v550_v55 = vld [vmem:[#allocation3 + $0xbf0] sm:$0xff] }
  0xd2   :  { %v533_v52 = vld [vmem:[#allocation3 + $0xb68] sm:$0xff]  ;;  %v551_v56 = vld [vmem:[#allocation3 + $0xbf8] sm:$0xff] }
  0xd3   :  { %2026 = vmatpush3.bf16.msra.mxu0 %v877_v1  ;;  %v493_v1 = vld [vmem:[#allocation3 + $0xa28] sm:$0xff] }
  0xd4   :  { %2048 = vmatpush3.bf16.msra.mxu1 %v893_v2  ;;  %2027 = vmatprep.subr.bf16.mxu0 %v886_v3  ;;  %v524_v2 = vld [vmem:[#allocation3 + $0xb20] sm:$0xff]  ;;  %v930_v3 = vpack.c.bf16 %v541_v59, %v540_v58  ;;  %v906_v9 = vpack.c.bf16 %v493_v1, %v492_v0  ;;  %v502_v58 = vld [vmem:[#allocation3 + $0xa70] sm:$0xff]  ;;  %v926_v59 = vpack.c.bf16 %v533_v52, %v532_v50  ;;  %v575_v50 = vld [vmem:[#allocation3 + $0xcb8] sm:$0xff] }
  0xd5   :  { %2049 = vmatprep.subr.bf16.mxu1 %v902_v7  ;;  %v542_v7 = vld [vmem:[#allocation3 + $0xbb0] sm:$0xff]  ;;  %v922_v10 = vpack.c.bf16 %v525_v4, %v524_v2  ;;  %v935_v0 = vpack.c.bf16 %v551_v56, %v550_v55  ;;  %v80_v1 = vld [vmem:[%s2631_s0 + $0xa0] sm:$0xff] }
  0xd6   :  { %v568_v2 = vld [vmem:[#allocation3 + $0xc80] sm:$0xff]  ;;  %v607_v52 = vld [vmem:[#allocation3 + $0xdb8] sm:$0xff]  ;;  %v558_v56 = vld [vmem:[#allocation3 + $0xc30] sm:$0xff] }
  0xd7   :  { %2028 = vmatpush3.bf16.msra.mxu0 %v878_v13  ;;  %v495_v13 = vld [vmem:[#allocation3 + $0xa38] sm:$0xff] }
  0xd8   :  { %2050 = vmatpush3.bf16.msra.mxu1 %v894_v15  ;;  %2029 = vmatprep.subr.bf16.mxu0 %v887_v16  ;;  %v931_v15 = vpack.c.bf16 %v543_v8, %v542_v7  ;;  %v527_v16 = vld [vmem:[#allocation3 + $0xb38] sm:$0xff]  ;;  %v907_v21 = vpack.c.bf16 %v495_v13, %v494_v12  ;;  %v82_v8 = vld [vmem:[%s2631_s0 + $0xb0] sm:$0xff] }
  0xd9   :  { %2051 = vmatprep.subr.bf16.mxu1 %v903_v20  ;;  %v545_v20 = vld [vmem:[#allocation3 + $0xbc8] sm:$0xff]  ;;  %v923_v22 = vpack.c.bf16 %v527_v16, %v526_v14  ;;  %v116_v4 = vld [vmem:[%s2631_s0 + $0x1c0] sm:$0xff]  ;;  %v960_v16 = vpack.c.bf16 %v601_v6, %v600_v5 }
  0xda   :  { %v553_v13 = vld [vmem:[#allocation3 + $0xc08] sm:$0xff]  ;;  %v584_v14 = vld [vmem:[#allocation3 + $0xd00] sm:$0xff] }
  0xdb   :  { %2030 = vmatpush3.bf16.msra.mxu0 %v879_v27  ;;  %v932_v27 = vpack.c.bf16 %v545_v20, %v544_v19  ;;  %v602_v19 = vld [vmem:[#allocation3 + $0xd90] sm:$0xff]  ;;  %v152_v20 = vpack.c.bf16 %v116_v4, %v80_v1  ;;  %v560_v4 = vld [vmem:[#allocation3 + $0xc40] sm:$0xff]  ;;  %v561_v5 = vld [vmem:[#allocation3 + $0xc48] sm:$0xff] }
  0xdc   :  { %2052 = vmatpush3.bf16.msra.mxu1 %v895_v31  ;;  %2059 = vmatprep.subr.bf16.mxu0 %v912_v32  ;;  %v546_v31 = vld [vmem:[#allocation3 + $0xbd0] sm:$0xff]  ;;  %v547_v32 = vld [vmem:[#allocation3 + $0xbd8] sm:$0xff]  ;;  %v592_v6 = vld [vmem:[#allocation3 + $0xd40] sm:$0xff] }
  0xdd   :  { %2081 = vmatprep.subr.bf16.mxu1 %v928_v36  ;;  %v498_v36 = vld [vmem:[#allocation3 + $0xa50] sm:$0xff]  ;;  %v933_v39 = vpack.c.bf16 %v547_v32, %v546_v31  ;;  %v555_v31 = vld [vmem:[#allocation3 + $0xc18] sm:$0xff] }
  0xde   :  { %1400 = vmatmul.mubr.bf16.vlgmr.msra.gmra.mrb[16].mxu0 %v148_v40  ;;  %v531_v40 = vld [vmem:[#allocation3 + $0xb58] sm:$0xff]  ;;  %v586_v32 = vld [vmem:[#allocation3 + $0xd10] sm:$0xff]  ;;  %v937_v41 = vpack.c.bf16 %v555_v31, %v554_v30  ;;  %v596_v30 = vld [vmem:[#allocation3 + $0xd60] sm:$0xff] }
  0xdf   :  { %1441 = vmatmul.mubr.bf16.vlgmr.msra.gmra.mrb[16].mxu1 %v150_v44  ;;  %2060 = vmatpush3.bf16.msra.mxu0 %v904_v45  ;;  %v549_v44 = vld [vmem:[#allocation3 + $0xbe8] sm:$0xff]  ;;  %v909_v45 = vpack.c.bf16 %v499_v37, %v498_v36  ;;  %v925_v46 = vpack.c.bf16 %v531_v40, %v530_v38  ;;  %v604_v38 = vld [vmem:[#allocation3 + $0xda0] sm:$0xff] }
  0xe0   :  { %2082 = vmatpush3.bf16.msra.mxu1 %v920_v48  ;;  %2061 = vmatprep.subr.bf16.mxu0 %v913_v49  ;;  %v500_v48 = vld [vmem:[#allocation3 + $0xa60] sm:$0xff]  ;;  %v501_v49 = vld [vmem:[#allocation3 + $0xa68] sm:$0xff]  ;;  %v934_v51 = vpack.c.bf16 %v549_v44, %v548_v43 }
  0xe1   :  { %2083 = vmatprep.subr.bf16.mxu1 %v929_v53  ;;  %1481 = vmatprep.mubr.bf16.mxu0 %v153_v57  ;;  %v518_v53 = vld [vmem:[#allocation3 + $0xaf0] sm:$0xff]  ;;  %v910_v57 = vpack.c.bf16 %v501_v49, %v500_v48  ;;  %v573_v36 = vld [vmem:[#allocation3 + $0xca8] sm:$0xff]  ;;  %v556_v44 = vld [vmem:[#allocation3 + $0xc20] sm:$0xff] }
  0xe2   :  { %1522 = vmatprep.mubr.bf16.mxu1 %v155_v60  ;;  %v919_v60 = vpack.c.bf16 %v519_v54, %v518_v53  ;;  %v589_v48 = vld [vmem:[#allocation3 + $0xd28] sm:$0xff]  ;;  %v574_v49 = vld [vmem:[#allocation3 + $0xcb0] sm:$0xff] }
  0xe3   :  { %2062 = vmatpush3.bf16.msra.mxu0 %v905_v61  ;;  %v503_v61 = vld [vmem:[#allocation3 + $0xa78] sm:$0xff]  ;;  %v947_v55 = vpack.c.bf16 %v575_v50, %v574_v49  ;;  %v664_v49 = vld [vmem:[#allocation3 + $0xf80] sm:$0xff]  ;;  %v665_v50 = vld [vmem:[#allocation3 + $0xf88] sm:$0xff] }
  0xe4   :  { %2084 = vmatpush3.bf16.msra.mxu1 %v921_v62  ;;  %2063 = vmatprep.subr.bf16.mxu0 %v914_v63  ;;  %v534_v62 = vld [vmem:[#allocation3 + $0xb70] sm:$0xff]  ;;  %v535_v63 = vld [vmem:[#allocation3 + $0xb78] sm:$0xff]  ;;  %v911_v7 = vpack.c.bf16 %v503_v61, %v502_v58  ;;  %v576_v61 = vld [vmem:[#allocation3 + $0xcc0] sm:$0xff] }
  0xe5   :  { %2085 = vmatprep.subr.bf16.mxu1 %v930_v3  ;;  %v569_v3 = vld [vmem:[#allocation3 + $0xc88] sm:$0xff]  ;;  %v590_v58 = vld [vmem:[#allocation3 + $0xd30] sm:$0xff] }
  0xe6   :  { %v944_v12 = vpack.c.bf16 %v569_v3, %v568_v2 }
  0xe7   :  { %2064 = vmatpush3.bf16.msra.mxu0 %v906_v9  ;;  %v118_v9 = vld [vmem:[%s2631_s0 + $0x1d0] sm:$0xff] }
  0xe8   :  { %2086 = vmatpush3.bf16.msra.mxu1 %v922_v10  ;;  %2065 = vmatprep.subr.bf16.mxu0 %v915_v11  ;;  %v552_v10 = vld [vmem:[#allocation3 + $0xc00] sm:$0xff]  ;;  %v927_v11 = vpack.c.bf16 %v535_v63, %v534_v62  ;;  %v154_v24 = vpack.c.bf16 %v118_v9, %v82_v8  ;;  %v577_v62 = vld [vmem:[#allocation3 + $0xcc8] sm:$0xff]  ;;  %v578_v9 = vld [vmem:[#allocation3 + $0xcd0] sm:$0xff] }
  0xe9   :  { %2087 = vmatprep.subr.bf16.mxu1 %v931_v15  ;;  %v585_v15 = vld [vmem:[#allocation3 + $0xd08] sm:$0xff]  ;;  %v936_v25 = vpack.c.bf16 %v553_v13, %v552_v10  ;;  %v608_v63 = vld [vmem:[#allocation3 + $0xdc0] sm:$0xff]  ;;  %v948_v3 = vpack.c.bf16 %v577_v62, %v576_v61  ;;  %v579_v10 = vld [vmem:[#allocation3 + $0xcd8] sm:$0xff]  ;;  %v940_v13 = vpack.c.bf16 %v561_v5, %v560_v4 }
  0xea   :  { %v952_v28 = vpack.c.bf16 %v585_v15, %v584_v14  ;;  %v593_v8 = vld [vmem:[#allocation3 + $0xd48] sm:$0xff]  ;;  %v949_v15 = vpack.c.bf16 %v579_v10, %v578_v9  ;;  %v634_v61 = vld [vmem:[#allocation3 + $0xe90] sm:$0xff]  ;;  %v635_v62 = vld [vmem:[#allocation3 + $0xe98] sm:$0xff] }
  0xeb   :  { %2066 = vmatpush3.bf16.msra.mxu0 %v907_v21  ;;  %v603_v21 = vld [vmem:[#allocation3 + $0xd98] sm:$0xff]  ;;  %v956_v14 = vpack.c.bf16 %v593_v8, %v592_v6  ;;  %v977_v9 = vpack.c.bf16 %v635_v62, %v634_v61  ;;  %v618_v10 = vld [vmem:[#allocation3 + $0xe10] sm:$0xff] }
  0xec   :  { %2088 = vmatpush3.bf16.msra.mxu1 %v923_v22  ;;  %2067 = vmatprep.subr.bf16.mxu0 %v916_v23  ;;  %v85_v22 = vld [vmem:[%s2631_s0 + $0xc8] sm:$0xff]  ;;  %v91_v6 = vld [vmem:[%s2631_s0 + $0xf8] sm:$0xff] }
  0xed   :  { %2089 = vmatprep.subr.bf16.mxu1 %v932_v27  ;;  %v121_v23 = vld [vmem:[%s2631_s0 + $0x1e8] sm:$0xff]  ;;  %v123_v27 = vld [vmem:[%s2631_s0 + $0x1f8] sm:$0xff] }
  0xee   :  { %v157_v37 = vpack.c.bf16 %v121_v23, %v85_v22  ;;  %v159_v40 = vpack.c.bf16 %v123_v27, %v87_v26  ;;  %v581_v22 = vld [vmem:[#allocation3 + $0xce8] sm:$0xff]  ;;  %v612_v23 = vld [vmem:[#allocation3 + $0xde0] sm:$0xff]  ;;  %v627_v61 = vld [vmem:[#allocation3 + $0xe58] sm:$0xff] }
  0xef   :  { %2068 = vmatpush3.bf16.msra.mxu0 %v908_v33  ;;  %v961_v33 = vpack.c.bf16 %v603_v21, %v602_v19  ;;  %v580_v21 = vld [vmem:[#allocation3 + $0xce0] sm:$0xff]  ;;  %v658_v62 = vld [vmem:[#allocation3 + $0xf50] sm:$0xff] }
  0xf0   :  { %2090 = vmatpush3.bf16.msra.mxu1 %v924_v34  ;;  %2069 = vmatprep.subr.bf16.mxu0 %v917_v35  ;;  %v587_v34 = vld [vmem:[#allocation3 + $0xd18] sm:$0xff]  ;;  %v572_v35 = vld [vmem:[#allocation3 + $0xca0] sm:$0xff]  ;;  %v950_v27 = vpack.c.bf16 %v581_v22, %v580_v21 }
  0xf1   :  { %2091 = vmatprep.subr.bf16.mxu1 %v933_v39  ;;  %v605_v39 = vld [vmem:[#allocation3 + $0xda8] sm:$0xff]  ;;  %v953_v42 = vpack.c.bf16 %v587_v34, %v586_v32  ;;  %v946_v43 = vpack.c.bf16 %v573_v36, %v572_v35  ;;  %v583_v34 = vld [vmem:[#allocation3 + $0xcf8] sm:$0xff]  ;;  %v614_v35 = vld [vmem:[#allocation3 + $0xdf0] sm:$0xff] }
  0xf2   :  { %v597_v32 = vld [vmem:[#allocation3 + $0xd68] sm:$0xff]  ;;  %v615_v36 = vld [vmem:[#allocation3 + $0xdf8] sm:$0xff] }
  0xf3   :  { %2070 = vmatpush3.bf16.msra.mxu0 %v909_v45  ;;  %v557_v45 = vld [vmem:[#allocation3 + $0xc28] sm:$0xff] }
  0xf4   :  { %2092 = vmatpush3.bf16.msra.mxu1 %v925_v46  ;;  %2071 = vmatprep.subr.bf16.mxu0 %v918_v47  ;;  %v588_v46 = vld [vmem:[#allocation3 + $0xd20] sm:$0xff]  ;;  %v962_v47 = vpack.c.bf16 %v605_v39, %v604_v38  ;;  %v938_v53 = vpack.c.bf16 %v557_v45, %v556_v44  ;;  %v566_v38 = vld [vmem:[#allocation3 + $0xc70] sm:$0xff]  ;;  %v958_v39 = vpack.c.bf16 %v597_v32, %v596_v30  ;;  %v639_v30 = vld [vmem:[#allocation3 + $0xeb8] sm:$0xff] }
  0xf5   :  { %2093 = vmatprep.subr.bf16.mxu1 %v934_v51  ;;  %v606_v51 = vld [vmem:[#allocation3 + $0xdb0] sm:$0xff]  ;;  %v954_v54 = vpack.c.bf16 %v589_v48, %v588_v46  ;;  %v967_v44 = vpack.c.bf16 %v615_v36, %v614_v35  ;;  %v84_v45 = vld [vmem:[%s2631_s0 + $0xc0] sm:$0xff] }
  0xf6   :  { %v632_v46 = vld [vmem:[#allocation3 + $0xe80] sm:$0xff]  ;;  %v671_v32 = vld [vmem:[#allocation3 + $0xfb8] sm:$0xff]  ;;  %v622_v36 = vld [vmem:[#allocation3 + $0xe30] sm:$0xff] }
  0xf7   :  { %2072 = vmatpush3.bf16.msra.mxu0 %v910_v57  ;;  %v559_v57 = vld [vmem:[#allocation3 + $0xc38] sm:$0xff] }
  0xf8   :  { %2094 = vmatpush3.bf16.msra.mxu1 %v926_v59  ;;  %2073 = vmatprep.subr.bf16.mxu0 %v919_v60  ;;  %v963_v59 = vpack.c.bf16 %v607_v52, %v606_v51  ;;  %v591_v60 = vld [vmem:[#allocation3 + $0xd38] sm:$0xff]  ;;  %v939_v1 = vpack.c.bf16 %v559_v57, %v558_v56  ;;  %v86_v52 = vld [vmem:[%s2631_s0 + $0xd0] sm:$0xff] }
  0xf9   :  { %2095 = vmatprep.subr.bf16.mxu1 %v935_v0  ;;  %v609_v0 = vld [vmem:[#allocation3 + $0xdc8] sm:$0xff]  ;;  %v955_v2 = vpack.c.bf16 %v591_v60, %v590_v58  ;;  %v120_v48 = vld [vmem:[%s2631_s0 + $0x1e0] sm:$0xff]  ;;  %v992_v60 = vpack.c.bf16 %v665_v50, %v664_v49 }
  0xfa   :  { %v617_v57 = vld [vmem:[#allocation3 + $0xe08] sm:$0xff]  ;;  %v648_v58 = vld [vmem:[#allocation3 + $0xf00] sm:$0xff] }
  0xfb   :  { %2074 = vmatpush3.bf16.msra.mxu0 %v911_v7  ;;  %v964_v7 = vpack.c.bf16 %v609_v0, %v608_v63  ;;  %v666_v63 = vld [vmem:[#allocation3 + $0xf90] sm:$0xff]  ;;  %v156_v0 = vpack.c.bf16 %v120_v48, %v84_v45  ;;  %v624_v48 = vld [vmem:[#allocation3 + $0xe40] sm:$0xff]  ;;  %v625_v49 = vld [vmem:[#allocation3 + $0xe48] sm:$0xff] }
  0xfc   :  { %2096 = vmatpush3.bf16.msra.mxu1 %v927_v11  ;;  %2103 = vmatprep.subr.bf16.mxu0 %v944_v12  ;;  %v610_v11 = vld [vmem:[#allocation3 + $0xdd0] sm:$0xff]  ;;  %v611_v12 = vld [vmem:[#allocation3 + $0xdd8] sm:$0xff]  ;;  %v656_v50 = vld [vmem:[#allocation3 + $0xf40] sm:$0xff] }
  0xfd   :  { %2125 = vmatprep.subr.bf16.mxu1 %v960_v16  ;;  %v562_v16 = vld [vmem:[#allocation3 + $0xc50] sm:$0xff]  ;;  %v965_v19 = vpack.c.bf16 %v611_v12, %v610_v11  ;;  %v619_v11 = vld [vmem:[#allocation3 + $0xe18] sm:$0xff] }
  0xfe   :  { %1482 = vmatmul.mubr.bf16.vlgmr.msra.gmra.mrb[20].mxu0 %v152_v20  ;;  %v595_v20 = vld [vmem:[#allocation3 + $0xd58] sm:$0xff]  ;;  %v650_v12 = vld [vmem:[#allocation3 + $0xf10] sm:$0xff]  ;;  %v969_v21 = vpack.c.bf16 %v619_v11, %v618_v10  ;;  %v660_v10 = vld [vmem:[#allocation3 + $0xf60] sm:$0xff] }
  0xff   :  { %1523 = vmatmul.mubr.bf16.vlgmr.msra.gmra.mrb[20].mxu1 %v154_v24  ;;  %2104 = vmatpush3.bf16.msra.mxu0 %v936_v25  ;;  %v613_v24 = vld [vmem:[#allocation3 + $0xde8] sm:$0xff]  ;;  %v941_v25 = vpack.c.bf16 %v563_v17, %v562_v16  ;;  %v957_v26 = vpack.c.bf16 %v595_v20, %v594_v18  ;;  %v668_v18 = vld [vmem:[#allocation3 + $0xfa0] sm:$0xff] }
 0x100   :  { %2126 = vmatpush3.bf16.msra.mxu1 %v952_v28  ;;  %2105 = vmatprep.subr.bf16.mxu0 %v945_v29  ;;  %v564_v28 = vld [vmem:[#allocation3 + $0xc60] sm:$0xff]  ;;  %v565_v29 = vld [vmem:[#allocation3 + $0xc68] sm:$0xff]  ;;  %v966_v31 = vpack.c.bf16 %v613_v24, %v612_v23 }
 0x101   :  { %2127 = vmatprep.subr.bf16.mxu1 %v961_v33  ;;  %1563 = vmatprep.mubr.bf16.mxu0 %v157_v37  ;;  %v582_v33 = vld [vmem:[#allocation3 + $0xcf0] sm:$0xff]  ;;  %v942_v37 = vpack.c.bf16 %v565_v29, %v564_v28  ;;  %v637_v16 = vld [vmem:[#allocation3 + $0xea8] sm:$0xff]  ;;  %v620_v24 = vld [vmem:[#allocation3 + $0xe20] sm:$0xff] }
 0x102   :  { %1604 = vmatprep.mubr.bf16.mxu1 %v159_v40  ;;  %v951_v40 = vpack.c.bf16 %v583_v34, %v582_v33  ;;  %v653_v28 = vld [vmem:[#allocation3 + $0xf28] sm:$0xff]  ;;  %v638_v29 = vld [vmem:[#allocation3 + $0xeb0] sm:$0xff] }
 0x103   :  { %2106 = vmatpush3.bf16.msra.mxu0 %v937_v41  ;;  %v567_v41 = vld [vmem:[#allocation3 + $0xc78] sm:$0xff]  ;;  %v979_v35 = vpack.c.bf16 %v639_v30, %v638_v29 }
 0x104   :  { %2128 = vmatpush3.bf16.msra.mxu1 %v953_v42  ;;  %2107 = vmatprep.subr.bf16.mxu0 %v946_v43  ;;  %v598_v42 = vld [vmem:[#allocation3 + $0xd70] sm:$0xff]  ;;  %v599_v43 = vld [vmem:[#allocation3 + $0xd78] sm:$0xff]  ;;  %v943_v51 = vpack.c.bf16 %v567_v41, %v566_v38  ;;  %v640_v41 = vld [vmem:[#allocation3 + $0xec0] sm:$0xff] }
 0x105   :  { %2129 = vmatprep.subr.bf16.mxu1 %v962_v47  ;;  %v633_v47 = vld [vmem:[#allocation3 + $0xe88] sm:$0xff]  ;;  %v654_v38 = vld [vmem:[#allocation3 + $0xf30] sm:$0xff] }
 0x106   :  { %v976_v56 = vpack.c.bf16 %v633_v47, %v632_v46 }
 0x107   :  { %2108 = vmatpush3.bf16.msra.mxu0 %v938_v53  ;;  %v122_v53 = vld [vmem:[%s2631_s0 + $0x1f0] sm:$0xff] }
 0x108   :  { %2130 = vmatpush3.bf16.msra.mxu1 %v954_v54  ;;  %2109 = vmatprep.subr.bf16.mxu0 %v947_v55  ;;  %v616_v54 = vld [vmem:[#allocation3 + $0xe00] sm:$0xff]  ;;  %v959_v55 = vpack.c.bf16 %v599_v43, %v598_v42  ;;  %v158_v4 = vpack.c.bf16 %v122_v53, %v86_v52  ;;  %v641_v42 = vld [vmem:[#allocation3 + $0xec8] sm:$0xff]  ;;  %v642_v53 = vld [vmem:[#allocation3 + $0xed0] sm:$0xff] }
 0x109   :  { %2131 = vmatprep.subr.bf16.mxu1 %v963_v59  ;;  %v649_v59 = vld [vmem:[#allocation3 + $0xf08] sm:$0xff]  ;;  %v968_v5 = vpack.c.bf16 %v617_v57, %v616_v54  ;;  %v672_v43 = vld [vmem:[#allocation3 + $0xfc0] sm:$0xff]  ;;  %v980_v47 = vpack.c.bf16 %v641_v42, %v640_v41  ;;  %v643_v54 = vld [vmem:[#allocation3 + $0xed8] sm:$0xff]  ;;  %v972_v57 = vpack.c.bf16 %v625_v49, %v624_v48 }
 0x10a   :  { %v984_v8 = vpack.c.bf16 %v649_v59, %v648_v58  ;;  %v657_v52 = vld [vmem:[#allocation3 + $0xf48] sm:$0xff]  ;;  %v981_v59 = vpack.c.bf16 %v643_v54, %v642_v53  ;;  %v124_v42 = vld [vmem:[%s2631_s0 + $0x200] sm:$0xff] }
 0x10b   :  { %2110 = vmatpush3.bf16.msra.mxu0 %v939_v1  ;;  %v667_v1 = vld [vmem:[#allocation3 + $0xf98] sm:$0xff]  ;;  %v988_v58 = vpack.c.bf16 %v657_v52, %v656_v50  ;;  %v90_v48 = vld [vmem:[%s2631_s0 + $0xf0] sm:$0xff]  ;;  %v680_v50 = vld [vmem:[#allocation3 + $0x1000] sm:$0xff] }
 0x10c   :  { %2132 = vmatpush3.bf16.msra.mxu1 %v955_v2  ;;  %2111 = vmatprep.subr.bf16.mxu0 %v948_v3  ;;  %v89_v2 = vld [vmem:[%s2631_s0 + $0xe8] sm:$0xff]  ;;  %v126_v49 = vld [vmem:[%s2631_s0 + $0x210] sm:$0xff] }
 0x10d   :  { %2133 = vmatprep.subr.bf16.mxu1 %v964_v7  ;;  %v125_v3 = vld [vmem:[%s2631_s0 + $0x208] sm:$0xff]  ;;  %v127_v7 = vld [vmem:[%s2631_s0 + $0x218] sm:$0xff] }
 0x10e   :  { %v161_v17 = vpack.c.bf16 %v125_v3, %v89_v2  ;;  %v163_v20 = vpack.c.bf16 %v127_v7, %v91_v6  ;;  %v645_v2 = vld [vmem:[#allocation3 + $0xee8] sm:$0xff]  ;;  %v676_v3 = vld [vmem:[#allocation3 + $0xfe0] sm:$0xff] }
 0x10f   :  { %2112 = vmatpush3.bf16.msra.mxu0 %v940_v13  ;;  %v993_v13 = vpack.c.bf16 %v667_v1, %v666_v63  ;;  %v644_v1 = vld [vmem:[#allocation3 + $0xee0] sm:$0xff]  ;;  %v681_v53 = vld [vmem:[#allocation3 + $0x1008] sm:$0xff] }
 0x110   :  { %2134 = vmatpush3.bf16.msra.mxu1 %v956_v14  ;;  %2113 = vmatprep.subr.bf16.mxu0 %v949_v15  ;;  %v651_v14 = vld [vmem:[#allocation3 + $0xf18] sm:$0xff]  ;;  %v636_v15 = vld [vmem:[#allocation3 + $0xea0] sm:$0xff]  ;;  %v982_v7 = vpack.c.bf16 %v645_v2, %v644_v1  ;;  %v162_v1 = vpack.c.bf16 %v126_v49, %v90_v48  ;;  %v1000_v2 = vpack.c.bf16 %v681_v53, %v680_v50  ;;  %v721_v50 = vld [vmem:[#allocation3 + $0x1148] sm:$0xff] }
 0x111   :  { %2135 = vmatprep.subr.bf16.mxu1 %v965_v19  ;;  %v669_v19 = vld [vmem:[#allocation3 + $0xfa8] sm:$0xff]  ;;  %v985_v22 = vpack.c.bf16 %v651_v14, %v650_v12  ;;  %v978_v23 = vpack.c.bf16 %v637_v16, %v636_v15  ;;  %v646_v14 = vld [vmem:[#allocation3 + $0xef0] sm:$0xff]  ;;  %v647_v15 = vld [vmem:[#allocation3 + $0xef8] sm:$0xff] }
 0x112   :  { %v983_v30 = vpack.c.bf16 %v647_v15, %v646_v14  ;;  %v712_v54 = vld [vmem:[#allocation3 + $0x1100] sm:$0xff]  ;;  %v738_v53 = vld [vmem:[#allocation3 + $0x11d0] sm:$0xff] }
 0x113   :  { %2114 = vmatpush3.bf16.msra.mxu0 %v941_v25  ;;  %v621_v25 = vld [vmem:[#allocation3 + $0xe28] sm:$0xff]  ;;  %v732_v15 = vld [vmem:[#allocation3 + $0x11a0] sm:$0xff] }
 0x114   :  { %2136 = vmatpush3.bf16.msra.mxu1 %v957_v26  ;;  %2115 = vmatprep.subr.bf16.mxu0 %v950_v27  ;;  %v652_v26 = vld [vmem:[#allocation3 + $0xf20] sm:$0xff]  ;;  %v994_v27 = vpack.c.bf16 %v669_v19, %v668_v18  ;;  %v970_v33 = vpack.c.bf16 %v621_v25, %v620_v24  ;;  %v678_v19 = vld [vmem:[#allocation3 + $0xff0] sm:$0xff] }
 0x115   :  { %2137 = vmatprep.subr.bf16.mxu1 %v966_v31  ;;  %v670_v31 = vld [vmem:[#allocation3 + $0xfb0] sm:$0xff]  ;;  %v986_v34 = vpack.c.bf16 %v653_v28, %v652_v26  ;;  %v720_v48 = vld [vmem:[#allocation3 + $0x1140] sm:$0xff] }
 0x116   :  { %v630_v25 = vld [vmem:[#allocation3 + $0xe70] sm:$0xff] }
 0x117   :  { %2116 = vmatpush3.bf16.msra.mxu0 %v942_v37  ;;  %v623_v37 = vld [vmem:[#allocation3 + $0xe38] sm:$0xff] }
 0x118   :  { %2138 = vmatpush3.bf16.msra.mxu1 %v958_v39  ;;  %2117 = vmatprep.subr.bf16.mxu0 %v951_v40  ;;  %v995_v39 = vpack.c.bf16 %v671_v32, %v670_v31  ;;  %v655_v40 = vld [vmem:[#allocation3 + $0xf38] sm:$0xff]  ;;  %v971_v45 = vpack.c.bf16 %v623_v37, %v622_v36  ;;  %v662_v32 = vld [vmem:[#allocation3 + $0xf70] sm:$0xff] }
 0x119   :  { %2139 = vmatprep.subr.bf16.mxu1 %v967_v44  ;;  %v673_v44 = vld [vmem:[#allocation3 + $0xfc8] sm:$0xff]  ;;  %v987_v46 = vpack.c.bf16 %v655_v40, %v654_v38  ;;  %v631_v31 = vld [vmem:[#allocation3 + $0xe78] sm:$0xff] }
 0x11a   :  { %v88_v38 = vld [vmem:[%s2631_s0 + $0xe0] sm:$0xff]  ;;  %v697_v40 = vld [vmem:[#allocation3 + $0x1088] sm:$0xff] }
 0x11b   :  { %2118 = vmatpush3.bf16.msra.mxu0 %v943_v51  ;;  %v996_v51 = vpack.c.bf16 %v673_v44, %v672_v43  ;;  %v728_v43 = vld [vmem:[#allocation3 + $0x1180] sm:$0xff]  ;;  %v729_v44 = vld [vmem:[#allocation3 + $0x1188] sm:$0xff] }
 0x11c   :  { %2140 = vmatpush3.bf16.msra.mxu1 %v959_v55  ;;  %2147 = vmatprep.subr.bf16.mxu0 %v976_v56  ;;  %v674_v55 = vld [vmem:[#allocation3 + $0xfd0] sm:$0xff]  ;;  %v675_v56 = vld [vmem:[#allocation3 + $0xfd8] sm:$0xff] }
 0x11d   :  { %2169 = vmatprep.subr.bf16.mxu1 %v992_v60  ;;  %v626_v60 = vld [vmem:[#allocation3 + $0xe50] sm:$0xff]  ;;  %v997_v63 = vpack.c.bf16 %v675_v56, %v674_v55  ;;  %v713_v55 = vld [vmem:[#allocation3 + $0x1108] sm:$0xff] }
 0x11e   :  { %1564 = vmatmul.mubr.bf16.vlgmr.msra.gmra.mrb[24].mxu0 %v156_v0  ;;  %v659_v0 = vld [vmem:[#allocation3 + $0xf58] sm:$0xff] }
 0x11f   :  { %1605 = vmatmul.mubr.bf16.vlgmr.msra.gmra.mrb[24].mxu1 %v158_v4  ;;  %2148 = vmatpush3.bf16.msra.mxu0 %v968_v5  ;;  %v677_v4 = vld [vmem:[#allocation3 + $0xfe8] sm:$0xff]  ;;  %v973_v5 = vpack.c.bf16 %v627_v61, %v626_v60  ;;  %v989_v6 = vpack.c.bf16 %v659_v0, %v658_v62  ;;  %v730_v60 = vld [vmem:[#allocation3 + $0x1190] sm:$0xff]  ;;  %v160_v61 = vpack.c.bf16 %v124_v42, %v88_v38  ;;  %v731_v62 = vld [vmem:[#allocation3 + $0x1198] sm:$0xff] }
 0x120   :  { %2170 = vmatpush3.bf16.msra.mxu1 %v984_v8  ;;  %2149 = vmatprep.subr.bf16.mxu0 %v977_v9  ;;  %v628_v8 = vld [vmem:[#allocation3 + $0xe60] sm:$0xff]  ;;  %v629_v9 = vld [vmem:[#allocation3 + $0xe68] sm:$0xff]  ;;  %v998_v12 = vpack.c.bf16 %v677_v4, %v676_v3  ;;  %v95_v3 = vld [vmem:[%s2631_s0 + $0x118] sm:$0xff] }
 0x121   :  { %2171 = vmatprep.subr.bf16.mxu1 %v993_v13  ;;  %1645 = vmatprep.mubr.bf16.mxu0 %v161_v17  ;;  %v661_v13 = vld [vmem:[#allocation3 + $0xf68] sm:$0xff]  ;;  %v1834_v17 = vld [vmem:[#allocation5] ss:$0 sm:$0xff]  ;;  %v974_v24 = vpack.c.bf16 %v629_v9, %v628_v8  ;;  %v131_v4 = vld [vmem:[%s2631_s0 + $0x238] sm:$0xff] }
 0x122   :  { %1686 = vmatprep.mubr.bf16.mxu1 %v163_v20  ;;  %v679_v20 = vld [vmem:[#allocation3 + $0xff8] sm:$0xff]  ;;  %v990_v29 = vpack.c.bf16 %v661_v13, %v660_v10  ;;  %v129_v0 = vld [vmem:[%s2631_s0 + $0x228] sm:$0xff]  ;;  %v714_v9 = vld [vmem:[#allocation3 + $0x1110] sm:$0xff]  ;;  %v1025_v10 = vpack.c.bf16 %v731_v62, %v730_v60 }
 0x123   :  { %2150 = vmatpush3.bf16.msra.mxu0 %v969_v21  ;;  %v999_v37 = vpack.c.bf16 %v679_v20, %v678_v19  ;;  %v683_v8 = vld [vmem:[#allocation3 + $0x1018] sm:$0xff]  ;;  %v701_v13 = vld [vmem:[#allocation3 + $0x10a8] sm:$0xff]  ;;  %v704_v38 = vld [vmem:[#allocation3 + $0x10c0] sm:$0xff] }
 0x124   :  { %2172 = vmatpush3.bf16.msra.mxu1 %v985_v22  ;;  %2151 = vmatprep.subr.bf16.mxu0 %v978_v23  ;;  %v691_v60 = vld [vmem:[#allocation3 + $0x1058] sm:$0xff] }
 0x125   :  { %2173 = vmatprep.subr.bf16.mxu1 %v994_v27 }
 0x127   :  { %2152 = vmatpush3.bf16.msra.mxu0 %v970_v33  ;;  %v663_v33 = vld [vmem:[#allocation3 + $0xf78] sm:$0xff] }
 0x128   :  { %2174 = vmatpush3.bf16.msra.mxu1 %v986_v34  ;;  %2153 = vmatprep.subr.bf16.mxu0 %v979_v35 }
 0x129   :  { %2175 = vmatprep.subr.bf16.mxu1 %v995_v39  ;;  %v696_v39 = vld [vmem:[#allocation3 + $0x1080] sm:$0xff] }
 0x12a   :  { %v1008_v52 = vpack.c.bf16 %v697_v40, %v696_v39  ;;  %v705_v39 = vld [vmem:[#allocation3 + $0x10c8] sm:$0xff]  ;;  %v736_v40 = vld [vmem:[#allocation3 + $0x11c0] sm:$0xff] }
 0x12b   :  { %2154 = vmatpush3.bf16.msra.mxu0 %v971_v45 }
 0x12c   :  { %2176 = vmatpush3.bf16.msra.mxu1 %v987_v46  ;;  %2155 = vmatprep.subr.bf16.mxu0 %v980_v47  ;;  %v975_v47 = vpack.c.bf16 %v631_v31, %v630_v25  ;;  %v717_v25 = vld [vmem:[#allocation3 + $0x1128] sm:$0xff] }
 0x12d   :  { %2177 = vmatprep.subr.bf16.mxu1 %v996_v51  ;;  %v991_v51 = vpack.c.bf16 %v663_v33, %v662_v32  ;;  %v686_v33 = vld [vmem:[#allocation3 + $0x1030] sm:$0xff] }
 0x12f   :  { %2156 = vmatpush3.bf16.msra.mxu0 %v972_v57  ;;  %v1024_v57 = vpack.c.bf16 %v729_v44, %v728_v43  ;;  %v1012_v44 = vpack.c.bf16 %v705_v39, %v704_v38 }
 0x130   :  { %2178 = vmatpush3.bf16.msra.mxu1 %v988_v58  ;;  %2157 = vmatprep.subr.bf16.mxu0 %v981_v59  ;;  %v698_v58 = vld [vmem:[#allocation3 + $0x1090] sm:$0xff]  ;;  %v699_v59 = vld [vmem:[#allocation3 + $0x1098] sm:$0xff] }
 0x131   :  { %v1855_v11 = vpop.f32.mrb[0].mxu0  ;;  %2179 = vmatprep.subr.bf16.mxu1 %v997_v63  ;;  %v93_v63 = vld [vmem:[%s2631_s0 + $0x108] sm:$0xff] }
 0x132   :  { %v1877_v16 = vpop.f32.mrb[0].mxu1  ;;  %v1856_v18 = vpop.f32.mrb[1].mxu0  ;;  %v165_v14 = vpack.c.bf16 %v129_v0, %v93_v63  ;;  %v723_v63 = vld [vmem:[#allocation3 + $0x1158] sm:$0xff]  ;;  %v708_v0 = vld [vmem:[#allocation3 + $0x10e0] sm:$0xff] }
 0x133   :  { %v1857_v21 = vadd.f32 %v1856_v18, %v1855_v11  ;;  %v1878_v22 = vpop.f32.mrb[1].mxu1  ;;  %v1858_v23 = vpop.f32.mrb[2].mxu0  ;;  %2158 = vmatpush3.bf16.msra.mxu0 %v973_v5  ;;  %v1016_v5 = vpack.c.bf16 %v713_v55, %v712_v54  ;;  %v715_v11 = vld [vmem:[#allocation3 + $0x1118] sm:$0xff] }
 0x134   :  { %v1879_v26 = vadd.f32 %v1878_v22, %v1877_v16  ;;  %v1880_v27 = vpop.f32.mrb[2].mxu1  ;;  %2180 = vmatpush3.bf16.msra.mxu1 %v989_v6  ;;  %v1859_v28 = vpop.f32.mrb[3].mxu0  ;;  %2159 = vmatprep.subr.bf16.mxu0 %v982_v7  ;;  %v1009_v6 = vpack.c.bf16 %v699_v59, %v698_v58  ;;  %v682_v7 = vld [vmem:[#allocation3 + $0x1010] sm:$0xff]  ;;  %v733_v16 = vld [vmem:[#allocation3 + $0x11a8] sm:$0xff]  ;;  %v1017_v19 = vpack.c.bf16 %v715_v11, %v714_v9  ;;  %v739_v54 = vld [vmem:[#allocation3 + $0x11d8] sm:$0xff] }
 0x135   :  { %v1074_v34 = vadd.f32 %v1857_v21, %v1834_v17  ;;  %v1860_v35 = vadd.f32 %v1859_v28, %v1858_v23  ;;  %v1881_v36 = vpop.f32.mrb[3].mxu1  ;;  %2181 = vmatprep.subr.bf16.mxu1 %v998_v12  ;;  %v700_v12 = vld [vmem:[#allocation3 + $0x10a0] sm:$0xff]  ;;  %v1001_v18 = vpack.c.bf16 %v683_v8, %v682_v7  ;;  %v685_v22 = vld [vmem:[#allocation3 + $0x1028] sm:$0xff]  ;;  %v734_v28 = vld [vmem:[#allocation3 + $0x11b0] sm:$0xff]  ;;  %v1029_v62 = vpack.c.bf16 %v739_v54, %v738_v53 }
 0x136   :  { %v1882_v41 = vadd.f32 %v1881_v36, %v1880_v27  ;;  %v1010_v20 = vpack.c.bf16 %v701_v13, %v700_v12  ;;  %v684_v21 = vld [vmem:[#allocation3 + $0x1020] sm:$0xff]  ;;  %v703_v27 = vld [vmem:[#allocation3 + $0x10b8] sm:$0xff]  ;;  %v690_v59 = vld [vmem:[#allocation3 + $0x1050] sm:$0xff] }
 0x137   :  { %v2589_v45 = vadd.f32 %v1879_v26, %v1074_v34  ;;  %v1077_v46 = vadd.f32 %v1860_v35, %v1834_v17  ;;  %2160 = vmatpush3.bf16.msra.mxu0 %v974_v24  ;;  %v167_v17 = vpack.c.bf16 %v131_v4, %v95_v3  ;;  %v716_v23 = vld [vmem:[#allocation3 + $0x1120] sm:$0xff]  ;;  %v1026_v24 = vpack.c.bf16 %v733_v16, %v732_v15  ;;  %v702_v26 = vld [vmem:[#allocation3 + $0x10b0] sm:$0xff]  ;;  %v687_v34 = vld [vmem:[#allocation3 + $0x1038] sm:$0xff] }
 0x138   :  { %2182 = vmatpush3.bf16.msra.mxu1 %v990_v29  ;;  %2161 = vmatprep.subr.bf16.mxu0 %v983_v30  ;;  %v735_v29 = vld [vmem:[#allocation3 + $0x11b8] sm:$0xff]  ;;  %v1002_v30 = vpack.c.bf16 %v685_v22, %v684_v21  ;;  %v1018_v31 = vpack.c.bf16 %v717_v25, %v716_v23  ;;  %v1011_v32 = vpack.c.bf16 %v703_v27, %v702_v26  ;;  %v718_v35 = vld [vmem:[#allocation3 + $0x1130] sm:$0xff]  ;;  %v741_v3 = vld [vmem:[#allocation3 + $0x11e8] sm:$0xff] }
 0x139   :  { %v2597_v56 = vadd.f32 %v1882_v41, %v1077_v46  ;;  %2183 = vmatprep.subr.bf16.mxu1 %v999_v37  ;;  %v1027_v36 = vpack.c.bf16 %v735_v29, %v734_v28  ;;  %v719_v37 = vld [vmem:[#allocation3 + $0x1138] sm:$0xff]  ;;  %v737_v41 = vld [vmem:[#allocation3 + $0x11c8] sm:$0xff]  ;;  %v1003_v42 = vpack.c.bf16 %v687_v34, %v686_v33  ;;  %v688_v46 = vld [vmem:[#allocation3 + $0x1040] sm:$0xff]  ;;  %v1005_v4 = vpack.c.bf16 %v691_v60, %v690_v59 }
 0x13a   :  { %v1019_v43 = vpack.c.bf16 %v719_v37, %v718_v35  ;;  %v1028_v49 = vpack.c.bf16 %v737_v41, %v736_v40  ;;  %v692_v7 = vld [vmem:[#allocation3 + $0x1060] sm:$0xff]  ;;  %v693_v8 = vld [vmem:[#allocation3 + $0x1068] sm:$0xff]  ;;  %v710_v13 = vld [vmem:[#allocation3 + $0x10f0] sm:$0xff] }
 0x13b   :  { %2162 = vmatpush3.bf16.msra.mxu0 %v975_v47  ;;  %v689_v47 = vld [vmem:[#allocation3 + $0x1048] sm:$0xff]  ;;  %v724_v9 = vld [vmem:[#allocation3 + $0x1160] sm:$0xff]  ;;  %v1006_v22 = vpack.c.bf16 %v693_v8, %v692_v7  ;;  %v694_v28 = vld [vmem:[#allocation3 + $0x1070] sm:$0xff] }
 0x13c   :  { %2184 = vmatpush3.bf16.msra.mxu1 %v991_v51  ;;  %2191 = vmatprep.subr.bf16.mxu0 %v1008_v52  ;;  %v706_v51 = vld [vmem:[#allocation3 + $0x10d0] sm:$0xff]  ;;  %v707_v52 = vld [vmem:[#allocation3 + $0x10d8] sm:$0xff]  ;;  %v1004_v55 = vpack.c.bf16 %v689_v47, %v688_v46  ;;  %v725_v12 = vld [vmem:[#allocation3 + $0x1168] sm:$0xff] }
 0x13d   :  { %2213 = vmatprep.subr.bf16.mxu1 %v1024_v57  ;;  %v1020_v57 = vpack.c.bf16 %v721_v50, %v720_v48  ;;  %v1013_v58 = vpack.c.bf16 %v707_v52, %v706_v51  ;;  %v1022_v26 = vpack.c.bf16 %v725_v12, %v724_v9  ;;  %v695_v29 = vld [vmem:[#allocation3 + $0x1078] sm:$0xff]  ;;  %v726_v34 = vld [vmem:[#allocation3 + $0x1170] sm:$0xff] }
 0x13e   :  { %1646 = vmatmul.mubr.bf16.vlgmr.msra.gmra.mrb[28].mxu0 %v160_v61  ;;  %v722_v61 = vld [vmem:[#allocation3 + $0x1150] sm:$0xff]  ;;  %v727_v35 = vld [vmem:[#allocation3 + $0x1178] sm:$0xff]  ;;  %v1007_v39 = vpack.c.bf16 %v695_v29, %v694_v28 }
 0x13f   :  { %1687 = vmatmul.mubr.bf16.vlgmr.msra.gmra.mrb[28].mxu1 %v162_v1  ;;  %2192 = vmatpush3.bf16.msra.mxu0 %v1000_v2  ;;  %v709_v1 = vld [vmem:[#allocation3 + $0x10e8] sm:$0xff]  ;;  %v740_v2 = vld [vmem:[#allocation3 + $0x11e0] sm:$0xff]  ;;  %v1023_v41 = vpack.c.bf16 %v727_v35, %v726_v34 }
 0x140   :  { %2214 = vmatpush3.bf16.msra.mxu1 %v1016_v5  ;;  %2193 = vmatprep.subr.bf16.mxu0 %v1009_v6  ;;  %v1021_v5 = vpack.c.bf16 %v723_v63, %v722_v61  ;;  %v1014_v6 = vpack.c.bf16 %v709_v1, %v708_v0  ;;  %v1030_v11 = vpack.c.bf16 %v741_v3, %v740_v2  ;;  %v92_v40 = vld [vmem:[%s2631_s0 + $0x100] sm:$0xff] }
 0x141   :  { %2215 = vmatprep.subr.bf16.mxu1 %v1025_v10  ;;  %1727 = vmatprep.mubr.bf16.mxu0 %v165_v14  ;;  %v711_v14 = vld [vmem:[#allocation3 + $0x10f8] sm:$0xff] }
 0x142   :  { %1768 = vmatprep.mubr.bf16.mxu1 %v167_v17  ;;  %v742_v17 = vld [vmem:[#allocation3 + $0x11f0] sm:$0xff]  ;;  %v1015_v27 = vpack.c.bf16 %v711_v14, %v710_v13 }
 0x143   :  { %2194 = vmatpush3.bf16.msra.mxu0 %v1001_v18  ;;  %v743_v18 = vld [vmem:[#allocation3 + $0x11f8] sm:$0xff] }
 0x144   :  { %2216 = vmatpush3.bf16.msra.mxu1 %v1017_v19  ;;  %2195 = vmatprep.subr.bf16.mxu0 %v1010_v20  ;;  %v1031_v33 = vpack.c.bf16 %v743_v18, %v742_v17 }
 0x145   :  { %2217 = vmatprep.subr.bf16.mxu1 %v1026_v24 }
 0x147   :  { %2196 = vmatpush3.bf16.msra.mxu0 %v1002_v30 }
 0x148   :  { %2218 = vmatpush3.bf16.msra.mxu1 %v1018_v31  ;;  %2197 = vmatprep.subr.bf16.mxu0 %v1011_v32 }
 0x149   :  { %2219 = vmatprep.subr.bf16.mxu1 %v1027_v36 }
 0x14b   :  { %2198 = vmatpush3.bf16.msra.mxu0 %v1003_v42  ;;  %v94_v42 = vld [vmem:[%s2631_s0 + $0x110] sm:$0xff] }
 0x14c   :  { %2220 = vmatpush3.bf16.msra.mxu1 %v1019_v43  ;;  %2199 = vmatprep.subr.bf16.mxu0 %v1012_v44 }
 0x14d   :  { %2221 = vmatprep.subr.bf16.mxu1 %v1028_v49 }
 0x14f   :  { %2200 = vmatpush3.bf16.msra.mxu0 %v1004_v55 }
 0x150   :  { %2222 = vmatpush3.bf16.msra.mxu1 %v1020_v57  ;;  %2201 = vmatprep.subr.bf16.mxu0 %v1013_v58 }
 0x151   :  { %v1899_v10 = vpop.f32.mrb[4].mxu0  ;;  %2223 = vmatprep.subr.bf16.mxu1 %v1029_v62 }
 0x152   :  { %v1921_v15 = vpop.f32.mrb[4].mxu1  ;;  %v1900_v16 = vpop.f32.mrb[5].mxu0 }
 0x153   :  { %v1901_v19 = vadd.f32 %v1900_v16, %v1899_v10  ;;  %v1922_v20 = vpop.f32.mrb[5].mxu1  ;;  %v1902_v21 = vpop.f32.mrb[6].mxu0  ;;  %2202 = vmatpush3.bf16.msra.mxu0 %v1005_v4 }
 0x154   :  { %v1923_v23 = vadd.f32 %v1922_v20, %v1921_v15  ;;  %v1924_v24 = vpop.f32.mrb[6].mxu1  ;;  %2224 = vmatpush3.bf16.msra.mxu1 %v1021_v5  ;;  %v1903_v25 = vpop.f32.mrb[7].mxu0  ;;  %2203 = vmatprep.subr.bf16.mxu0 %v1014_v6 }
 0x155   :  { %v1156_v30 = vadd.f32 %v1901_v19, %v2589_v45  ;;  %v1904_v31 = vadd.f32 %v1903_v25, %v1902_v21  ;;  %v1925_v32 = vpop.f32.mrb[7].mxu1  ;;  %2225 = vmatprep.subr.bf16.mxu1 %v1030_v11  ;;  %v128_v45 = vld [vmem:[%s2631_s0 + $0x220] sm:$0xff] }
 0x156   :  { %v1926_v36 = vadd.f32 %v1925_v32, %v1924_v24  ;;  %v164_v44 = vpack.c.bf16 %v128_v45, %v92_v40 }
 0x157   :  { %v1197_v37 = vadd.f32 %v1923_v23, %v1156_v30  ;;  %v1159_v38 = vadd.f32 %v1904_v31, %v2597_v56  ;;  %2204 = vmatpush3.bf16.msra.mxu0 %v1006_v22  ;;  %v130_v56 = vld [vmem:[%s2631_s0 + $0x230] sm:$0xff] }
 0x158   :  { %2226 = vmatpush3.bf16.msra.mxu1 %v1022_v26  ;;  %2205 = vmatprep.subr.bf16.mxu0 %v1015_v27  ;;  %v166_v46 = vpack.c.bf16 %v130_v56, %v94_v42 }
 0x159   :  { %v1200_v43 = vadd.f32 %v1926_v36, %v1159_v38  ;;  %2227 = vmatprep.subr.bf16.mxu1 %v1031_v33 }
 0x15b   :  { %2206 = vmatpush3.bf16.msra.mxu0 %v1007_v39 }
 0x15c   :  { %2228 = vmatpush3.bf16.msra.mxu1 %v1023_v41 }
 0x15e   :  { %1728 = vmatmul.mubr.bf16.vlgmr.msra.gmra.mrb[32].mxu0 %v164_v44 }
 0x15f   :  { %1769 = vmatmul.mubr.bf16.vlgmr.msra.gmra.mrb[32].mxu1 %v166_v46 }
 0x171   :  { %v1943_v47 = vpop.f32.mrb[8].mxu0 }
 0x172   :  { %v1965_v48 = vpop.f32.mrb[8].mxu1  ;;  %v1944_v49 = vpop.f32.mrb[9].mxu0 }
 0x173   :  { %v1945_v50 = vadd.f32 %v1944_v49, %v1943_v47  ;;  %v1966_v51 = vpop.f32.mrb[9].mxu1  ;;  %v1946_v52 = vpop.f32.mrb[10].mxu0 }
 0x174   :  { %v1967_v53 = vadd.f32 %v1966_v51, %v1965_v48  ;;  %v1968_v54 = vpop.f32.mrb[10].mxu1  ;;  %v1947_v55 = vpop.f32.mrb[11].mxu0 }
 0x175   :  { %v1238_v57 = vadd.f32 %v1945_v50, %v1197_v37  ;;  %v1948_v58 = vadd.f32 %v1947_v55, %v1946_v52  ;;  %v1969_v59 = vpop.f32.mrb[11].mxu1 }
 0x176   :  { %v1970_v60 = vadd.f32 %v1969_v59, %v1968_v54 }
 0x177   :  { %v1279_v61 = vadd.f32 %v1967_v53, %v1238_v57  ;;  %v1241_v62 = vadd.f32 %v1948_v58, %v1200_v43 }
 0x179   :  { %v1282_v63 = vadd.f32 %v1970_v60, %v1241_v62 }
 0x191   :  { %v1987_v0 = vpop.f32.mrb[12].mxu0 }
 0x192   :  { %v2009_v1 = vpop.f32.mrb[12].mxu1  ;;  %v1988_v2 = vpop.f32.mrb[13].mxu0 }
 0x193   :  { %v1989_v3 = vadd.f32 %v1988_v2, %v1987_v0  ;;  %v2010_v4 = vpop.f32.mrb[13].mxu1  ;;  %v1990_v5 = vpop.f32.mrb[14].mxu0 }
 0x194   :  { %v2011_v6 = vadd.f32 %v2010_v4, %v2009_v1  ;;  %v2012_v7 = vpop.f32.mrb[14].mxu1  ;;  %v1991_v8 = vpop.f32.mrb[15].mxu0 }
 0x195   :  { %v1320_v9 = vadd.f32 %v1989_v3, %v1279_v61  ;;  %v1992_v10 = vadd.f32 %v1991_v8, %v1990_v5  ;;  %v2013_v11 = vpop.f32.mrb[15].mxu1 }
 0x196   :  { %v2014_v12 = vadd.f32 %v2013_v11, %v2012_v7 }
 0x197   :  { %v1361_v13 = vadd.f32 %v2011_v6, %v1320_v9  ;;  %v1323_v14 = vadd.f32 %v1992_v10, %v1282_v63 }
 0x199   :  { %v1364_v15 = vadd.f32 %v2014_v12, %v1323_v14 }
 0x1b1   :  { %v2031_v16 = vpop.f32.mrb[16].mxu0 }
 0x1b2   :  { %v2053_v17 = vpop.f32.mrb[16].mxu1  ;;  %v2032_v18 = vpop.f32.mrb[17].mxu0 }
 0x1b3   :  { %v2033_v19 = vadd.f32 %v2032_v18, %v2031_v16  ;;  %v2054_v20 = vpop.f32.mrb[17].mxu1  ;;  %v2034_v21 = vpop.f32.mrb[18].mxu0 }
 0x1b4   :  { %v2055_v22 = vadd.f32 %v2054_v20, %v2053_v17  ;;  %v2056_v23 = vpop.f32.mrb[18].mxu1  ;;  %v2035_v24 = vpop.f32.mrb[19].mxu0 }
 0x1b5   :  { %v1402_v25 = vadd.f32 %v2033_v19, %v1361_v13  ;;  %v2036_v26 = vadd.f32 %v2035_v24, %v2034_v21  ;;  %v2057_v27 = vpop.f32.mrb[19].mxu1 }
 0x1b6   :  { %v2058_v28 = vadd.f32 %v2057_v27, %v2056_v23 }
 0x1b7   :  { %v1443_v29 = vadd.f32 %v2055_v22, %v1402_v25  ;;  %v1405_v30 = vadd.f32 %v2036_v26, %v1364_v15 }
 0x1b9   :  { %v1446_v31 = vadd.f32 %v2058_v28, %v1405_v30 }
 0x1d1   :  { %v2075_v32 = vpop.f32.mrb[20].mxu0 }
 0x1d2   :  { %v2097_v33 = vpop.f32.mrb[20].mxu1  ;;  %v2076_v34 = vpop.f32.mrb[21].mxu0 }
 0x1d3   :  { %v2077_v35 = vadd.f32 %v2076_v34, %v2075_v32  ;;  %v2098_v36 = vpop.f32.mrb[21].mxu1  ;;  %v2078_v37 = vpop.f32.mrb[22].mxu0 }
 0x1d4   :  { %v2099_v38 = vadd.f32 %v2098_v36, %v2097_v33  ;;  %v2100_v39 = vpop.f32.mrb[22].mxu1  ;;  %v2079_v40 = vpop.f32.mrb[23].mxu0 }
 0x1d5   :  { %v1484_v45 = vadd.f32 %v2077_v35, %v1443_v29  ;;  %v2080_v41 = vadd.f32 %v2079_v40, %v2078_v37  ;;  %v2101_v42 = vpop.f32.mrb[23].mxu1  ;;  %v1837_v40 = vld [vmem:[#allocation7] ss:$0 sm:$0xff] }
 0x1d6   :  { %v2102_v56 = vadd.f32 %v2101_v42, %v2100_v39 }
 0x1d7   :  { %v1525_v43 = vadd.f32 %v2099_v38, %v1484_v45  ;;  %v1487_v44 = vadd.f32 %v2080_v41, %v1446_v31 }
 0x1d9   :  { %v1528_v46 = vadd.f32 %v2102_v56, %v1487_v44 }
 0x1f1   :  { %v2119_v47 = vpop.f32.mrb[24].mxu0 }
 0x1f2   :  { %v2141_v48 = vpop.f32.mrb[24].mxu1  ;;  %v2120_v49 = vpop.f32.mrb[25].mxu0 }
 0x1f3   :  { %v2121_v50 = vadd.f32 %v2120_v49, %v2119_v47  ;;  %v2142_v51 = vpop.f32.mrb[25].mxu1  ;;  %v2122_v52 = vpop.f32.mrb[26].mxu0 }
 0x1f4   :  { %v2143_v53 = vadd.f32 %v2142_v51, %v2141_v48  ;;  %v2144_v54 = vpop.f32.mrb[26].mxu1  ;;  %v2123_v55 = vpop.f32.mrb[27].mxu0 }
 0x1f5   :  { %v1566_v57 = vadd.f32 %v2121_v50, %v1525_v43  ;;  %v2124_v58 = vadd.f32 %v2123_v55, %v2122_v52  ;;  %v2145_v59 = vpop.f32.mrb[27].mxu1 }
 0x1f6   :  { %v2146_v60 = vadd.f32 %v2145_v59, %v2144_v54 }
 0x1f7   :  { %v1607_v61 = vadd.f32 %v2143_v53, %v1566_v57  ;;  %v1569_v62 = vadd.f32 %v2124_v58, %v1528_v46  ;;  %v1838_v46 = vld [vmem:[#allocation2] ss:$0 sm:$0xff] }
 0x1f9   :  { %v1610_v63 = vadd.f32 %v2146_v60, %v1569_v62 }
 0x211   :  { %v2163_v0 = vpop.f32.mrb[28].mxu0 }
 0x212   :  { %v2185_v1 = vpop.f32.mrb[28].mxu1  ;;  %v2164_v2 = vpop.f32.mrb[29].mxu0 }
 0x213   :  { %v2165_v3 = vadd.f32 %v2164_v2, %v2163_v0  ;;  %v2186_v4 = vpop.f32.mrb[29].mxu1  ;;  %v2166_v5 = vpop.f32.mrb[30].mxu0 }
 0x214   :  { %v2187_v6 = vadd.f32 %v2186_v4, %v2185_v1  ;;  %v2188_v7 = vpop.f32.mrb[30].mxu1  ;;  %v2167_v8 = vpop.f32.mrb[31].mxu0 }
 0x215   :  { %v1648_v9 = vadd.f32 %v2165_v3, %v1607_v61  ;;  %v2168_v10 = vadd.f32 %v2167_v8, %v2166_v5  ;;  %v2189_v11 = vpop.f32.mrb[31].mxu1 }
 0x216   :  { %v2190_v12 = vadd.f32 %v2189_v11, %v2188_v7 }
 0x217   :  { %v1689_v13 = vadd.f32 %v2187_v6, %v1648_v9  ;;  %v1651_v14 = vadd.f32 %v2168_v10, %v1610_v63 }
 0x219   :  { %v1692_v15 = vadd.f32 %v2190_v12, %v1651_v14 }
 0x231   :  { %v2207_v16 = vpop.f32.mrb[32].mxu0 }
 0x232   :  { %v2229_v17 = vpop.f32.mrb[32].mxu1  ;;  %v2208_v18 = vpop.f32.mrb[33].mxu0 }
 0x233   :  { %v2209_v19 = vadd.f32 %v2208_v18, %v2207_v16  ;;  %v2230_v20 = vpop.f32.mrb[33].mxu1  ;;  %v2210_v21 = vpop.f32.mrb[34].mxu0 }
 0x234   :  { %v2231_v22 = vadd.f32 %v2230_v20, %v2229_v17  ;;  %v2232_v23 = vpop.f32.mrb[34].mxu1  ;;  %v2211_v24 = vpop.f32.mrb[35].mxu0 }
 0x235   :  { %v1730_v25 = vadd.f32 %v2209_v19, %v1689_v13  ;;  %v2212_v26 = vadd.f32 %v2211_v24, %v2210_v21  ;;  %v2233_v27 = vpop.f32.mrb[35].mxu1 }
 0x236   :  { %v2234_v28 = vadd.f32 %v2233_v27, %v2232_v23 }
 0x237   :  { %v1771_v29 = vadd.f32 %v2231_v22, %v1730_v25  ;;  %v1733_v30 = vadd.f32 %v2212_v26, %v1692_v15 }
 0x239   :  { %v1779_v31 = vmul.f32 1.442695, %v1771_v29  ;;  %v1774_v32 = vadd.f32 %v2234_v28, %v1733_v30  ;;  %vm1777_vm0 = vcmp.gt.f32.partialorder %v1771_v29, 0.0 }
 0x23b   :  { %2240 = vpow2.f32 %v1779_v31  ;;  %v1781_v33 = vmul.f32 1.442695, %v1774_v32  ;;  %vm1778_vm1 = vcmp.gt.f32.partialorder %v1774_v32, 0.0 }
 0x23d   :  { %2242 = vpow2.f32 %v1781_v33 }
 0x245   :  { %v2241_v34 = vpop.eup %2240 }
 0x246   :  { %v1835_v35 = vadd.f32 -1.0, %v2241_v34 }
 0x247   :  { %v2243_v36 = vpop.eup %2242 }
 0x248   :  { %v1785_v37 = vmul.f32 1.6732632, %v1835_v35  ;;  %v1836_v38 = vadd.f32 -1.0, %v2243_v36 }
 0x24a   :  { %v1787_v39 = vsel %vm1777_vm0, %v1771_v29, %v1785_v37  ;;  %v1786_v45 = vmul.f32 1.6732632, %v1836_v38 }
 0x24b   :  { %v1789_v41 = vmul.f32 1.050701, %v1787_v39 }
 0x24c   :  { %v1788_v42 = vsel %vm1778_vm1, %v1774_v32, %v1786_v45 }
 0x24d   :  { %v1798_v56 = vmul.f32 %v1837_v40, %v1789_v41  ;;  %v1790_v43 = vmul.f32 1.050701, %v1788_v42 }
 0x24f   :  { %1800 = vadd.xlane.f32.xlu0 %v1798_v56  ;;  %v1799_v44 = vmul.f32 %v1837_v40, %v1790_v43 }
 0x253   :  { %1802 = vadd.xlane.f32.xlu0 %v1799_v44 }
 0x2dc   :  { %v1801_v47 = vpop.xlane.xlu0 %1800 }
 0x2dd   :  { %v1811_v48 = vadd.f32 %v1838_v46, %v1801_v47 }
 0x2df   :  { %v1813_v49 = vsub.f32 0.0, %v1811_v48 }
 0x2e0   :  { %v1803_v50 = vpop.xlane.xlu0 %1802 }
 0x2e1   :  { %v1815_v51 = vmul.f32 1.442695, %v1813_v49  ;;  %v1812_v52 = vadd.f32 %v1838_v46, %v1803_v50 }
 0x2e3   :  { %2244 = vpow2.f32 %v1815_v51  ;;  %v1814_v53 = vsub.f32 0.0, %v1812_v52 }
 0x2e5   :  { %v1817_v54 = vmul.f32 1.442695, %v1814_v53 }
 0x2e7   :  { %2246 = vpow2.f32 %v1817_v54 }
 0x2ed   :  { %v2245_v55 = vpop.eup %2244 }
 0x2ee   :  { %v1819_v57 = vadd.f32 1.0, %v2245_v55 }
 0x2f0   :  { %2248 = vrcp.f32 %v1819_v57 }
 0x2f1   :  { %v2247_v58 = vpop.eup %2246 }
 0x2f2   :  { %v1820_v59 = vadd.f32 1.0, %v2247_v58 }
 0x2f4   :  { %2250 = vrcp.f32 %v1820_v59 }
 0x2fa   :  { %v2249_v60 = vpop.eup %2248 }
 0x2fb   :  { %1826 = vst.msk [vmem:[%s2636_s5] sm:$0xff] %vm1825_vm2, %v2249_v60 }
 0x2fe   :  { %v2251_v61 = vpop.eup %2250 }
 0x2ff   :  { %1827 = vst.msk [vmem:[%s2636_s5 + $0x8] sm:$0xff] %vm1825_vm2, %v2251_v61 }
 0x300   :  { %1832 = vsyncpa [#allocation4], 1 }
 0x301   :  { %1833 = vsyncpa [#allocation6], 1 }

</bundles_post_ra>
